<compile_context>
chip_gen: v6e
topology: v6e:2x2x1
jax: 0.10.0
libtpu: 0.0.40
codegen_flags: <defaults>
</compile_context>

<pallas_src>
import functools
import numpy as np

import jax
import jax.numpy as jnp
from jax import lax
from jax.experimental import pallas as pl
from jax.experimental.pallas import tpu as pltpu

FEAT_DIM = 8
HIDDEN = 16          # C (out_channels per head)
HEADS = 8            # H
N_LAYERS = 3
NEG_SLOPE = 0.2
MASK_VAL = -1e30


# ----------------------------- Pallas kernel --------------------------------

def gat_fused_kernel(x_ref, w_ref, att_dst_ref, att_src_ref, bias_ref,
                     mask_ref, sel_ref, repl_ref, hmask_ref, esum_ref,
                     esum_t_ref, sumc_ref, pool_ref, xout_ref,
                     *, heads, feat_dim, n_layers):
    """All 3 GATConv(+ELU) layers + sum pooling, fully resident in VMEM.

    Lane layout: source-node/head pairs are flattened as q = j*H + h, so every
    attention tensor is [N, N*H] = [16, 128] (full 128-lane vregs).

    x_ref       : [N, F]          layer-0 node features
    w_ref       : [L, C, H*C]     shared lin weights (layer 0 uses rows [:F])
    att_dst_ref : [L, H*C, H]     block-diagonal att_dst (xw @ . -> per-head dots)
    att_src_ref : [L, 1, H*C]     att_src flattened per head block
    bias_ref    : [L, 1, C]
    mask_ref    : [N, N*H]        additive mask, tiled per head (0 / -1e30)
    sel_ref     : [G, N]          one-hot graph selector (global_add_pool)
    repl_ref    : [N*H, N]        0/1 row replicator: repl[j*H+h, j] = 1
    hmask_ref   : [N*H, H*C]      0/1 head selector:  1 iff h(row) == h(col-block)
    esum_ref    : [H, N*H]        head -> lane-group broadcaster
    esum_t_ref  : [N*H, H]        lane-group -> head reducer (softmax denom)
    sumc_ref    : [H*C, C]        sum-over-heads collector
    pool_ref    : [L, G, C]       per-layer pooled representations
    xout_ref    : [N, C]          last layer node features
    """
    mask = mask_ref[...]
    sel = sel_ref[...]
    repl = repl_ref[...]
    hmask = hmask_ref[...]
    esum = esum_ref[...]
    esum_t = esum_t_ref[...]
    sumc = sumc_ref[...]
    x = x_ref[...]
    inv_heads = 1.0 / heads

    for layer in range(n_layers):                      # static unroll over layers
        w = w_ref[layer]
        if layer == 0:
            w = w[:feat_dim, :]                        # layer-0 input width differs
        xw = jnp.dot(x, w, preferred_element_type=jnp.float32)               # [N, H*C]

        # destination logits, lane-dense: dst[i, j*H+h] = <xw[i, h-block], att_dst[h]>
        a_dst = jnp.dot(xw, att_dst_ref[layer],
                        preferred_element_type=jnp.float32)                  # [N, H]
        dst = jnp.dot(a_dst, esum, preferred_element_type=jnp.float32)       # [N, N*H]

        # replicated + head-masked features (pure MXU + one full-vreg multiply);
        # reused both for the source logits and for message aggregation.
        xw_rep = jnp.dot(repl, xw, preferred_element_type=jnp.float32)       # [N*H, H*C]
        xw_big = xw_rep * hmask                                              # [N*H, H*C]

        # source logits as one row: src[0, j*H+h] = <xw[j, h-block], att_src[h]>
        src = lax.dot_general(att_src_ref[layer], xw_big,
                              dimension_numbers=(((1,), (1,)), ((), ())),
                              preferred_element_type=jnp.float32)            # [1, N*H]

        # lane-dense masked softmax over source nodes, per (destination, head)
        e = dst + src
        e = jnp.where(e > 0, e, NEG_SLOPE * e) + mask                        # LeakyReLU + mask
        m = jnp.max(e, axis=-1, keepdims=True)                               # row max: exact shift
        p = jnp.exp(e - m)                                                   # masked -> exactly 0
        denom = jnp.dot(p, esum_t, preferred_element_type=jnp.float32)       # [N, H]
        denom = jnp.maximum(denom, 1e-30)                                    # guard head underflow
        # TODO(synk): approx=True would move this to the EUP slot but risks the
        # 1e-4 test tolerance; denominator is only [N, H] so it is negligible.
        inv = pl.reciprocal(denom, approx=False) * inv_heads                 # fold mean over heads
        attn = p * jnp.dot(inv, esum, preferred_element_type=jnp.float32)    # [N, N*H]

        # per-head aggregated messages -> sum over heads -> bias -> ELU
        t = jnp.dot(attn, xw_big, preferred_element_type=jnp.float32)        # [N, H*C]
        out = jnp.dot(t, sumc, preferred_element_type=jnp.float32) + bias_ref[layer]
        x = jnp.where(out > 0, out, jnp.exp(out) - 1.0)                      # ELU

        # global_add_pool fused in-kernel, stored per layer (no concatenates)
        pool_ref[layer] = jnp.dot(sel, x, preferred_element_type=jnp.float32)

    xout_ref[...] = x


# ------------------------------ host wrapper ---------------------------------

@jax.jit
def gat_forward(x, mask_tiled, sel, kernel_params):
    """Returns (global_rep [G, L*HIDDEN], x_last [N, HIDDEN])."""
    (w_all, att_dst_all, att_src_all, bias_all,
     repl, hmask, esum, esum_t, sumc) = kernel_params
    n = x.shape[0]
    g = sel.shape[0]

    vmem = pl.BlockSpec(memory_space=pltpu.MemorySpace.VMEM)
    pool, x_last = pl.pallas_call(
        functools.partial(gat_fused_kernel, heads=HEADS, feat_dim=FEAT_DIM,
                          n_layers=N_LAYERS),
        out_shape=(jax.ShapeDtypeStruct((N_LAYERS, g, HIDDEN), jnp.float32),
                   jax.ShapeDtypeStruct((n, HIDDEN), jnp.float32)),
        in_specs=[vmem] * 12,
        out_specs=(vmem, vmem),
    )(x, w_all, att_dst_all, att_src_all, bias_all, mask_tiled, sel,
      repl, hmask, esum, esum_t, sumc)

    global_rep = jnp.transpose(pool, (1, 0, 2)).reshape(g, N_LAYERS * HIDDEN)
    return global_rep, x_last


# ------------------------------ parameter init -------------------------------

def glorot(key, shape):
    fan_in, fan_out = shape[0], shape[1]
    limit = float(np.sqrt(6.0 / (fan_in + fan_out)))
    return jax.random.uniform(key, shape, jnp.float32, -limit, limit)


def make_att_block_diag(att):
    """att [H, C] -> block-diagonal [H*C, H] so that xw @ M gives per-head dots."""
    h, c = att.shape
    m = np.zeros((h * c, h), np.float32)
    att_np = np.asarray(att)
    for i in range(h):
        m[i * c:(i + 1) * c, i] = att_np[i]
    return jnp.asarray(m)


def init_params(key):
    raw = []
    w_list, adst_list, asrc_list, bias_list = [], [], [], []
    for i in range(N_LAYERS):
        f_in = FEAT_DIM if i == 0 else HIDDEN
        key, kw, ks, kd = jax.random.split(key, 4)
        w = glorot(kw, (f_in, HEADS * HIDDEN))
        att_src = glorot(ks, (HEADS, HIDDEN))
        att_dst = glorot(kd, (HEADS, HIDDEN))
        bias = jnp.zeros((HIDDEN,), jnp.float32)
        raw.append((w, att_src, att_dst, bias))

        w_pad = jnp.zeros((HIDDEN, HEADS * HIDDEN), jnp.float32).at[:f_in].set(w)
        w_list.append(w_pad)
        adst_list.append(make_att_block_diag(att_dst))                  # [H*C, H]
        asrc_list.append(jnp.reshape(att_src, (1, HEADS * HIDDEN)))     # [1, H*C]
        bias_list.append(bias.reshape(1, HIDDEN))
    learned = (jnp.stack(w_list),        # [L, C, H*C]
               jnp.stack(adst_list),     # [L, H*C, H]
               jnp.stack(asrc_list),     # [L, 1, H*C]
               jnp.stack(bias_list))     # [L, 1, C]
    return raw, learned


def build_graph_constants(adj_np):
    """Graph-size / structure constants, built ONCE on host (outside jit)."""
    n = adj_np.shape[0]
    nh = n * HEADS
    hc = HEADS * HIDDEN
    q_head = np.arange(nh) % HEADS                 # head index of lane q = j*H + h
    q_node = np.arange(nh) // HEADS                # source-node index of lane q
    repl = (q_node[:, None] == np.arange(n)[None, :]).astype(np.float32)          # [NH, N]
    hmask = (q_head[:, None] ==
             (np.arange(hc)[None, :] // HIDDEN)).astype(np.float32)               # [NH, HC]
    esum = (np.arange(HEADS)[:, None] == q_head[None, :]).astype(np.float32)      # [H, NH]
    esum_t = np.ascontiguousarray(esum.T)                                         # [NH, H]
    sumc = np.tile(np.eye(HIDDEN, dtype=np.float32), (HEADS, 1))                  # [HC, C]
    mask_base = np.where(adj_np > 0, 0.0, MASK_VAL).astype(np.float32)            # [N, N]
    mask_tiled = np.repeat(mask_base, HEADS, axis=1)                              # [N, NH]
    return (jnp.asarray(mask_tiled), jnp.asarray(repl), jnp.asarray(hmask),
            jnp.asarray(esum), jnp.asarray(esum_t), jnp.asarray(sumc))


# ------------------------------ pure-JAX reference ---------------------------

def gat_conv_ref(x, w, att_src, att_dst, bias, adj):
    n = x.shape[0]
    xw = (x @ w).reshape(n, HEADS, HIDDEN)
    a_s = (xw * att_src[None]).sum(-1)                    # [N, H]
    a_d = (xw * att_dst[None]).sum(-1)                    # [N, H]
    e = a_d[:, None, :] + a_s[None, :, :]                 # [N_dst, N_src, H]
    e = jnp.where(e > 0, e, NEG_SLOPE * e)
    e = jnp.where(adj[:, :, None] > 0, e, -1e30)
    p = jnp.exp(e - e.max(axis=1, keepdims=True)) * adj[:, :, None]
    attn = p / p.sum(axis=1, keepdims=True)
    out = jnp.einsum('ijh,jhc->ihc', attn, xw).mean(axis=1) + bias
    return jnp.where(out > 0, out, jnp.exp(out) - 1.0)


def gat_forward_ref(x, adj, sel, raw_params):
    xs = []
    for (w, a_s, a_d, b) in raw_params:
        x = gat_conv_ref(x, w, a_s, a_d, b, adj)
        xs.append(x)
    pooled = [sel @ xi for xi in xs]
    return jnp.concatenate(pooled, axis=1), x


# ------------------------------------ main ------------------------------------

if __name__ == "__main__":
    nodes_per_graph = 8
    n_graphs = 2
    N = nodes_per_graph * n_graphs

    # deterministic graph: a ring in each graph plus one chord, undirected edges
    edges = []
    for g in range(n_graphs):
        base = g * nodes_per_graph
        for k in range(nodes_per_graph):
            s, d = base + k, base + (k + 1) % nodes_per_graph
            edges.append((s, d))
            edges.append((d, s))
        edges.append((base, base + 4))
        edges.append((base + 4, base))

    adj_np = np.zeros((N, N), np.float32)
    for (src, dst) in edges:          # adj[dst, src] = 1  (source_to_target flow)
        adj_np[dst, src] = 1.0
    np.fill_diagonal(adj_np, 1.0)     # add_self_loops=True
    adj = jnp.asarray(adj_np)

    batch_np = np.repeat(np.arange(n_graphs), nodes_per_graph)
    sel = jnp.asarray(
        (batch_np[None, :] == np.arange(n_graphs)[:, None]).astype(np.float32))

    # graph-structure constants built once, outside the jitted hot path
    mask_tiled, repl, hmask, esum, esum_t, sumc = build_graph_constants(adj_np)

    key = jax.random.PRNGKey(0)
    key, kx = jax.random.split(key)
    x = jax.random.normal(kx, (N, FEAT_DIM), jnp.float32)

    raw_params, learned = init_params(key)
    kernel_params = learned + (repl, hmask, esum, esum_t, sumc)

    global_rep, x_last = gat_forward(x, mask_tiled, sel, kernel_params)
    jax.block_until_ready((global_rep, x_last))

    ref_rep, ref_x = gat_forward_ref(x, adj, sel, raw_params)
    np.testing.assert_allclose(np.asarray(global_rep), np.asarray(ref_rep),
                               rtol=1e-4, atol=1e-4)
    np.testing.assert_allclose(np.asarray(x_last), np.asarray(ref_x),
                               rtol=1e-4, atol=1e-4)

    assert global_rep.shape == (n_graphs, N_LAYERS * HIDDEN)
    assert x_last.shape == (N, HIDDEN)
    print("KERNEL_OK")
</pallas_src>

<mosaic_0001>
module attributes {stable_mosaic.version = 11 : i64} {
  func.func @gat_fused_kernel(%arg0: memref<16x8xf32, #tpu.memory_space<vmem>>, %arg1: memref<3x16x128xf32, #tpu.memory_space<vmem>>, %arg2: memref<3x128x8xf32, #tpu.memory_space<vmem>>, %arg3: memref<3x1x128xf32, #tpu.memory_space<vmem>>, %arg4: memref<3x1x16xf32, #tpu.memory_space<vmem>>, %arg5: memref<16x128xf32, #tpu.memory_space<vmem>>, %arg6: memref<2x16xf32, #tpu.memory_space<vmem>>, %arg7: memref<128x16xf32, #tpu.memory_space<vmem>>, %arg8: memref<128x128xf32, #tpu.memory_space<vmem>>, %arg9: memref<8x128xf32, #tpu.memory_space<vmem>>, %arg10: memref<128x8xf32, #tpu.memory_space<vmem>>, %arg11: memref<128x16xf32, #tpu.memory_space<vmem>>, %arg12: memref<3x2x16xf32, #tpu.memory_space<vmem>>, %arg13: memref<16x16xf32, #tpu.memory_space<vmem>>) attributes {dimension_semantics = [], scalar_prefetch = 0 : i64, scratch_operands = 0 : i64, tpu.core_type = #tpu.core_type<tc>} {
    %c0 = arith.constant 0 : index
    %c0_0 = arith.constant 0 : index
    %0 = vector.load %arg5[%c0, %c0_0] : memref<16x128xf32, #tpu.memory_space<vmem>>, vector<16x128xf32>
    %c0_1 = arith.constant 0 : index
    %c0_2 = arith.constant 0 : index
    %1 = vector.load %arg6[%c0_1, %c0_2] : memref<2x16xf32, #tpu.memory_space<vmem>>, vector<2x16xf32>
    %c0_3 = arith.constant 0 : index
    %c0_4 = arith.constant 0 : index
    %2 = vector.load %arg7[%c0_3, %c0_4] : memref<128x16xf32, #tpu.memory_space<vmem>>, vector<128x16xf32>
    %c0_5 = arith.constant 0 : index
    %c0_6 = arith.constant 0 : index
    %3 = vector.load %arg8[%c0_5, %c0_6] : memref<128x128xf32, #tpu.memory_space<vmem>>, vector<128x128xf32>
    %c0_7 = arith.constant 0 : index
    %c0_8 = arith.constant 0 : index
    %4 = vector.load %arg9[%c0_7, %c0_8] : memref<8x128xf32, #tpu.memory_space<vmem>>, vector<8x128xf32>
    %c0_9 = arith.constant 0 : index
    %c0_10 = arith.constant 0 : index
    %5 = vector.load %arg10[%c0_9, %c0_10] : memref<128x8xf32, #tpu.memory_space<vmem>>, vector<128x8xf32>
    %c0_11 = arith.constant 0 : index
    %c0_12 = arith.constant 0 : index
    %6 = vector.load %arg11[%c0_11, %c0_12] : memref<128x16xf32, #tpu.memory_space<vmem>>, vector<128x16xf32>
    %c0_13 = arith.constant 0 : index
    %c0_14 = arith.constant 0 : index
    %7 = vector.load %arg0[%c0_13, %c0_14] : memref<16x8xf32, #tpu.memory_space<vmem>>, vector<16x8xf32>
    %c0_15 = arith.constant 0 : index
    %c0_16 = arith.constant 0 : index
    %c0_17 = arith.constant 0 : index
    %8 = vector.load %arg1[%c0_15, %c0_16, %c0_17] : memref<3x16x128xf32, #tpu.memory_space<vmem>>, vector<1x16x128xf32>
    %9 = vector.shape_cast %8 : vector<1x16x128xf32> to vector<16x128xf32>
    %10 = vector.extract_strided_slice %9 {offsets = [0, 0], sizes = [8, 128], strides = [1, 1]} : vector<16x128xf32> to vector<8x128xf32>
    %cst = arith.constant dense<0.000000e+00> : vector<16x128xf32>
    %11 = tpu.matmul %7, %10, %cst {dimension_numbers = #tpu.dot_dimension_numbers<[1], [0], [0], [1], [0, 0, 1, 1], [], []>} : vector<16x8xf32>, vector<8x128xf32>, vector<16x128xf32> -> vector<16x128xf32>
    %c0_18 = arith.constant 0 : index
    %c0_19 = arith.constant 0 : index
    %c0_20 = arith.constant 0 : index
    %12 = vector.load %arg2[%c0_18, %c0_19, %c0_20] : memref<3x128x8xf32, #tpu.memory_space<vmem>>, vector<1x128x8xf32>
    %13 = vector.shape_cast %12 : vector<1x128x8xf32> to vector<128x8xf32>
    %cst_21 = arith.constant dense<0.000000e+00> : vector<16x8xf32>
    %14 = tpu.matmul %11, %13, %cst_21 {dimension_numbers = #tpu.dot_dimension_numbers<[1], [0], [0], [1], [0, 0, 1, 1], [], []>} : vector<16x128xf32>, vector<128x8xf32>, vector<16x8xf32> -> vector<16x8xf32>
    %cst_22 = arith.constant dense<0.000000e+00> : vector<16x128xf32>
    %15 = tpu.matmul %14, %4, %cst_22 {dimension_numbers = #tpu.dot_dimension_numbers<[1], [0], [0], [1], [0, 0, 1, 1], [], []>} : vector<16x8xf32>, vector<8x128xf32>, vector<16x128xf32> -> vector<16x128xf32>
    %cst_23 = arith.constant dense<0.000000e+00> : vector<128x128xf32>
    %16 = tpu.matmul %2, %11, %cst_23 {dimension_numbers = #tpu.dot_dimension_numbers<[1], [0], [0], [1], [0, 0, 1, 1], [], []>} : vector<128x16xf32>, vector<16x128xf32>, vector<128x128xf32> -> vector<128x128xf32>
    %17 = arith.mulf %16, %3 : vector<128x128xf32>
    %c0_24 = arith.constant 0 : index
    %c0_25 = arith.constant 0 : index
    %c0_26 = arith.constant 0 : index
    %18 = vector.load %arg3[%c0_24, %c0_25, %c0_26] : memref<3x1x128xf32, #tpu.memory_space<vmem>>, vector<1x1x128xf32>
    %19 = vector.shape_cast %18 : vector<1x1x128xf32> to vector<1x128xf32>
    %cst_27 = arith.constant dense<0.000000e+00> : vector<1x128xf32>
    %20 = tpu.matmul %19, %17, %cst_27 {dimension_numbers = #tpu.dot_dimension_numbers<[1], [1], [0], [0], [0, 0, 1, 0], [], []>} : vector<1x128xf32>, vector<128x128xf32>, vector<1x128xf32> -> vector<1x128xf32>
    %21 = vector.broadcast %20 : vector<1x128xf32> to vector<16x128xf32>
    %22 = arith.addf %15, %21 : vector<16x128xf32>
    %cst_28 = arith.constant 0.000000e+00 : f32
    %23 = vector.broadcast %cst_28 : f32 to vector<16x128xf32>
    %24 = arith.cmpf ogt, %22, %23 : vector<16x128xf32>
    %cst_29 = arith.constant 2.000000e-01 : f32
    %25 = vector.broadcast %cst_29 : f32 to vector<16x128xf32>
    %26 = arith.mulf %25, %22 : vector<16x128xf32>
    %27 = arith.select %24, %22, %26 : vector<16x128xi1>, vector<16x128xf32>
    %28 = arith.addf %27, %0 : vector<16x128xf32>
    %cst_30 = arith.constant dense<0xFF800000> : vector<16xf32>
    %29 = vector.multi_reduction <maximumf>, %28, %cst_30 [1] : vector<16x128xf32> to vector<16xf32>
    %30 = vector.shape_cast %29 : vector<16xf32> to vector<16x1xf32>
    %31 = vector.broadcast %30 : vector<16x1xf32> to vector<16x128xf32>
    %32 = arith.subf %28, %31 : vector<16x128xf32>
    %33 = math.exp %32 : vector<16x128xf32>
    %cst_31 = arith.constant dense<0.000000e+00> : vector<16x8xf32>
    %34 = tpu.matmul %33, %5, %cst_31 {dimension_numbers = #tpu.dot_dimension_numbers<[1], [0], [0], [1], [0, 0, 1, 1], [], []>} : vector<16x128xf32>, vector<128x8xf32>, vector<16x8xf32> -> vector<16x8xf32>
    %cst_32 = arith.constant 1.000000e-30 : f32
    %35 = vector.broadcast %cst_32 : f32 to vector<16x8xf32>
    %36 = arith.maximumf %34, %35 : vector<16x8xf32>
    %37 = tpu.reciprocal %36 : vector<16x8xf32> -> vector<16x8xf32>
    %cst_33 = arith.constant 1.250000e-01 : f32
    %38 = vector.broadcast %cst_33 : f32 to vector<16x8xf32>
    %39 = arith.mulf %37, %38 : vector<16x8xf32>
    %cst_34 = arith.constant dense<0.000000e+00> : vector<16x128xf32>
    %40 = tpu.matmul %39, %4, %cst_34 {dimension_numbers = #tpu.dot_dimension_numbers<[1], [0], [0], [1], [0, 0, 1, 1], [], []>} : vector<16x8xf32>, vector<8x128xf32>, vector<16x128xf32> -> vector<16x128xf32>
    %41 = arith.mulf %33, %40 : vector<16x128xf32>
    %cst_35 = arith.constant dense<0.000000e+00> : vector<16x128xf32>
    %42 = tpu.matmul %41, %17, %cst_35 {dimension_numbers = #tpu.dot_dimension_numbers<[1], [0], [0], [1], [0, 0, 1, 1], [], []>} : vector<16x128xf32>, vector<128x128xf32>, vector<16x128xf32> -> vector<16x128xf32>
    %cst_36 = arith.constant dense<0.000000e+00> : vector<16x16xf32>
    %43 = tpu.matmul %42, %6, %cst_36 {dimension_numbers = #tpu.dot_dimension_numbers<[1], [0], [0], [1], [0, 0, 1, 1], [], []>} : vector<16x128xf32>, vector<128x16xf32>, vector<16x16xf32> -> vector<16x16xf32>
    %c0_37 = arith.constant 0 : index
    %c0_38 = arith.constant 0 : index
    %c0_39 = arith.constant 0 : index
    %44 = vector.load %arg4[%c0_37, %c0_38, %c0_39] : memref<3x1x16xf32, #tpu.memory_space<vmem>>, vector<1x1x16xf32>
    %45 = vector.shape_cast %44 : vector<1x1x16xf32> to vector<1x16xf32>
    %46 = vector.broadcast %45 : vector<1x16xf32> to vector<16x16xf32>
    %47 = arith.addf %43, %46 : vector<16x16xf32>
    %cst_40 = arith.constant 0.000000e+00 : f32
    %48 = vector.broadcast %cst_40 : f32 to vector<16x16xf32>
    %49 = arith.cmpf ogt, %47, %48 : vector<16x16xf32>
    %50 = math.exp %47 : vector<16x16xf32>
    %cst_41 = arith.constant 1.000000e+00 : f32
    %51 = vector.broadcast %cst_41 : f32 to vector<16x16xf32>
    %52 = arith.subf %50, %51 : vector<16x16xf32>
    %53 = arith.select %49, %47, %52 : vector<16x16xi1>, vector<16x16xf32>
    %cst_42 = arith.constant dense<0.000000e+00> : vector<2x16xf32>
    %54 = tpu.matmul %1, %53, %cst_42 {dimension_numbers = #tpu.dot_dimension_numbers<[1], [0], [0], [1], [0, 0, 1, 1], [], []>} : vector<2x16xf32>, vector<16x16xf32>, vector<2x16xf32> -> vector<2x16xf32>
    %c0_43 = arith.constant 0 : index
    %c0_44 = arith.constant 0 : index
    %c0_45 = arith.constant 0 : index
    %55 = vector.load %arg12[%c0_43, %c0_44, %c0_45] : memref<3x2x16xf32, #tpu.memory_space<vmem>>, vector<1x2x16xf32>
    %56 = vector.shape_cast %55 : vector<1x2x16xf32> to vector<2x16xf32>
    %57 = vector.shape_cast %54 : vector<2x16xf32> to vector<1x2x16xf32>
    tpu.vector_store %arg12[%c0_43, %c0_44, %c0_45], %57 {strides = array<i32>} : memref<3x2x16xf32, #tpu.memory_space<vmem>>, vector<1x2x16xf32>,
    %c1 = arith.constant 1 : index
    %c0_46 = arith.constant 0 : index
    %c0_47 = arith.constant 0 : index
    %58 = vector.load %arg1[%c1, %c0_46, %c0_47] : memref<3x16x128xf32, #tpu.memory_space<vmem>>, vector<1x16x128xf32>
    %59 = vector.shape_cast %58 : vector<1x16x128xf32> to vector<16x128xf32>
    %cst_48 = arith.constant dense<0.000000e+00> : vector<16x128xf32>
    %60 = tpu.matmul %53, %59, %cst_48 {dimension_numbers = #tpu.dot_dimension_numbers<[1], [0], [0], [1], [0, 0, 1, 1], [], []>} : vector<16x16xf32>, vector<16x128xf32>, vector<16x128xf32> -> vector<16x128xf32>
    %c1_49 = arith.constant 1 : index
    %c0_50 = arith.constant 0 : index
    %c0_51 = arith.constant 0 : index
    %61 = vector.load %arg2[%c1_49, %c0_50, %c0_51] : memref<3x128x8xf32, #tpu.memory_space<vmem>>, vector<1x128x8xf32>
    %62 = vector.shape_cast %61 : vector<1x128x8xf32> to vector<128x8xf32>
    %cst_52 = arith.constant dense<0.000000e+00> : vector<16x8xf32>
    %63 = tpu.matmul %60, %62, %cst_52 {dimension_numbers = #tpu.dot_dimension_numbers<[1], [0], [0], [1], [0, 0, 1, 1], [], []>} : vector<16x128xf32>, vector<128x8xf32>, vector<16x8xf32> -> vector<16x8xf32>
    %cst_53 = arith.constant dense<0.000000e+00> : vector<16x128xf32>
    %64 = tpu.matmul %63, %4, %cst_53 {dimension_numbers = #tpu.dot_dimension_numbers<[1], [0], [0], [1], [0, 0, 1, 1], [], []>} : vector<16x8xf32>, vector<8x128xf32>, vector<16x128xf32> -> vector<16x128xf32>
    %cst_54 = arith.constant dense<0.000000e+00> : vector<128x128xf32>
    %65 = tpu.matmul %2, %60, %cst_54 {dimension_numbers = #tpu.dot_dimension_numbers<[1], [0], [0], [1], [0, 0, 1, 1], [], []>} : vector<128x16xf32>, vector<16x128xf32>, vector<128x128xf32> -> vector<128x128xf32>
    %66 = arith.mulf %65, %3 : vector<128x128xf32>
    %c1_55 = arith.constant 1 : index
    %c0_56 = arith.constant 0 : index
    %c0_57 = arith.constant 0 : index
    %67 = vector.load %arg3[%c1_55, %c0_56, %c0_57] : memref<3x1x128xf32, #tpu.memory_space<vmem>>, vector<1x1x128xf32>
    %68 = vector.shape_cast %67 : vector<1x1x128xf32> to vector<1x128xf32>
    %cst_58 = arith.constant dense<0.000000e+00> : vector<1x128xf32>
    %69 = tpu.matmul %68, %66, %cst_58 {dimension_numbers = #tpu.dot_dimension_numbers<[1], [1], [0], [0], [0, 0, 1, 0], [], []>} : vector<1x128xf32>, vector<128x128xf32>, vector<1x128xf32> -> vector<1x128xf32>
    %70 = vector.broadcast %69 : vector<1x128xf32> to vector<16x128xf32>
    %71 = arith.addf %64, %70 : vector<16x128xf32>
    %cst_59 = arith.constant 0.000000e+00 : f32
    %72 = vector.broadcast %cst_59 : f32 to vector<16x128xf32>
    %73 = arith.cmpf ogt, %71, %72 : vector<16x128xf32>
    %cst_60 = arith.constant 2.000000e-01 : f32
    %74 = vector.broadcast %cst_60 : f32 to vector<16x128xf32>
    %75 = arith.mulf %74, %71 : vector<16x128xf32>
    %76 = arith.select %73, %71, %75 : vector<16x128xi1>, vector<16x128xf32>
    %77 = arith.addf %76, %0 : vector<16x128xf32>
    %cst_61 = arith.constant dense<0xFF800000> : vector<16xf32>
    %78 = vector.multi_reduction <maximumf>, %77, %cst_61 [1] : vector<16x128xf32> to vector<16xf32>
    %79 = vector.shape_cast %78 : vector<16xf32> to vector<16x1xf32>
    %80 = vector.broadcast %79 : vector<16x1xf32> to vector<16x128xf32>
    %81 = arith.subf %77, %80 : vector<16x128xf32>
    %82 = math.exp %81 : vector<16x128xf32>
    %cst_62 = arith.constant dense<0.000000e+00> : vector<16x8xf32>
    %83 = tpu.matmul %82, %5, %cst_62 {dimension_numbers = #tpu.dot_dimension_numbers<[1], [0], [0], [1], [0, 0, 1, 1], [], []>} : vector<16x128xf32>, vector<128x8xf32>, vector<16x8xf32> -> vector<16x8xf32>
    %cst_63 = arith.constant 1.000000e-30 : f32
    %84 = vector.broadcast %cst_63 : f32 to vector<16x8xf32>
    %85 = arith.maximumf %83, %84 : vector<16x8xf32>
    %86 = tpu.reciprocal %85 : vector<16x8xf32> -> vector<16x8xf32>
    %cst_64 = arith.constant 1.250000e-01 : f32
    %87 = vector.broadcast %cst_64 : f32 to vector<16x8xf32>
    %88 = arith.mulf %86, %87 : vector<16x8xf32>
    %cst_65 = arith.constant dense<0.000000e+00> : vector<16x128xf32>
    %89 = tpu.matmul %88, %4, %cst_65 {dimension_numbers = #tpu.dot_dimension_numbers<[1], [0], [0], [1], [0, 0, 1, 1], [], []>} : vector<16x8xf32>, vector<8x128xf32>, vector<16x128xf32> -> vector<16x128xf32>
    %90 = arith.mulf %82, %89 : vector<16x128xf32>
    %cst_66 = arith.constant dense<0.000000e+00> : vector<16x128xf32>
    %91 = tpu.matmul %90, %66, %cst_66 {dimension_numbers = #tpu.dot_dimension_numbers<[1], [0], [0], [1], [0, 0, 1, 1], [], []>} : vector<16x128xf32>, vector<128x128xf32>, vector<16x128xf32> -> vector<16x128xf32>
    %cst_67 = arith.constant dense<0.000000e+00> : vector<16x16xf32>
    %92 = tpu.matmul %91, %6, %cst_67 {dimension_numbers = #tpu.dot_dimension_numbers<[1], [0], [0], [1], [0, 0, 1, 1], [], []>} : vector<16x128xf32>, vector<128x16xf32>, vector<16x16xf32> -> vector<16x16xf32>
    %c1_68 = arith.constant 1 : index
    %c0_69 = arith.constant 0 : index
    %c0_70 = arith.constant 0 : index
    %93 = vector.load %arg4[%c1_68, %c0_69, %c0_70] : memref<3x1x16xf32, #tpu.memory_space<vmem>>, vector<1x1x16xf32>
    %94 = vector.shape_cast %93 : vector<1x1x16xf32> to vector<1x16xf32>
    %95 = vector.broadcast %94 : vector<1x16xf32> to vector<16x16xf32>
    %96 = arith.addf %92, %95 : vector<16x16xf32>
    %cst_71 = arith.constant 0.000000e+00 : f32
    %97 = vector.broadcast %cst_71 : f32 to vector<16x16xf32>
    %98 = arith.cmpf ogt, %96, %97 : vector<16x16xf32>
    %99 = math.exp %96 : vector<16x16xf32>
    %cst_72 = arith.constant 1.000000e+00 : f32
    %100 = vector.broadcast %cst_72 : f32 to vector<16x16xf32>
    %101 = arith.subf %99, %100 : vector<16x16xf32>
    %102 = arith.select %98, %96, %101 : vector<16x16xi1>, vector<16x16xf32>
    %cst_73 = arith.constant dense<0.000000e+00> : vector<2x16xf32>
    %103 = tpu.matmul %1, %102, %cst_73 {dimension_numbers = #tpu.dot_dimension_numbers<[1], [0], [0], [1], [0, 0, 1, 1], [], []>} : vector<2x16xf32>, vector<16x16xf32>, vector<2x16xf32> -> vector<2x16xf32>
    %c1_74 = arith.constant 1 : index
    %c0_75 = arith.constant 0 : index
    %c0_76 = arith.constant 0 : index
    %104 = vector.load %arg12[%c1_74, %c0_75, %c0_76] : memref<3x2x16xf32, #tpu.memory_space<vmem>>, vector<1x2x16xf32>
    %105 = vector.shape_cast %104 : vector<1x2x16xf32> to vector<2x16xf32>
    %106 = vector.shape_cast %103 : vector<2x16xf32> to vector<1x2x16xf32>
    tpu.vector_store %arg12[%c1_74, %c0_75, %c0_76], %106 {strides = array<i32>} : memref<3x2x16xf32, #tpu.memory_space<vmem>>, vector<1x2x16xf32>,
    %c2 = arith.constant 2 : index
    %c0_77 = arith.constant 0 : index
    %c0_78 = arith.constant 0 : index
    %107 = vector.load %arg1[%c2, %c0_77, %c0_78] : memref<3x16x128xf32, #tpu.memory_space<vmem>>, vector<1x16x128xf32>
    %108 = vector.shape_cast %107 : vector<1x16x128xf32> to vector<16x128xf32>
    %cst_79 = arith.constant dense<0.000000e+00> : vector<16x128xf32>
    %109 = tpu.matmul %102, %108, %cst_79 {dimension_numbers = #tpu.dot_dimension_numbers<[1], [0], [0], [1], [0, 0, 1, 1], [], []>} : vector<16x16xf32>, vector<16x128xf32>, vector<16x128xf32> -> vector<16x128xf32>
    %c2_80 = arith.constant 2 : index
    %c0_81 = arith.constant 0 : index
    %c0_82 = arith.constant 0 : index
    %110 = vector.load %arg2[%c2_80, %c0_81, %c0_82] : memref<3x128x8xf32, #tpu.memory_space<vmem>>, vector<1x128x8xf32>
    %111 = vector.shape_cast %110 : vector<1x128x8xf32> to vector<128x8xf32>
    %cst_83 = arith.constant dense<0.000000e+00> : vector<16x8xf32>
    %112 = tpu.matmul %109, %111, %cst_83 {dimension_numbers = #tpu.dot_dimension_numbers<[1], [0], [0], [1], [0, 0, 1, 1], [], []>} : vector<16x128xf32>, vector<128x8xf32>, vector<16x8xf32> -> vector<16x8xf32>
    %cst_84 = arith.constant dense<0.000000e+00> : vector<16x128xf32>
    %113 = tpu.matmul %112, %4, %cst_84 {dimension_numbers = #tpu.dot_dimension_numbers<[1], [0], [0], [1], [0, 0, 1, 1], [], []>} : vector<16x8xf32>, vector<8x128xf32>, vector<16x128xf32> -> vector<16x128xf32>
    %cst_85 = arith.constant dense<0.000000e+00> : vector<128x128xf32>
    %114 = tpu.matmul %2, %109, %cst_85 {dimension_numbers = #tpu.dot_dimension_numbers<[1], [0], [0], [1], [0, 0, 1, 1], [], []>} : vector<128x16xf32>, vector<16x128xf32>, vector<128x128xf32> -> vector<128x128xf32>
    %115 = arith.mulf %114, %3 : vector<128x128xf32>
    %c2_86 = arith.constant 2 : index
    %c0_87 = arith.constant 0 : index
    %c0_88 = arith.constant 0 : index
    %116 = vector.load %arg3[%c2_86, %c0_87, %c0_88] : memref<3x1x128xf32, #tpu.memory_space<vmem>>, vector<1x1x128xf32>
    %117 = vector.shape_cast %116 : vector<1x1x128xf32> to vector<1x128xf32>
    %cst_89 = arith.constant dense<0.000000e+00> : vector<1x128xf32>
    %118 = tpu.matmul %117, %115, %cst_89 {dimension_numbers = #tpu.dot_dimension_numbers<[1], [1], [0], [0], [0, 0, 1, 0], [], []>} : vector<1x128xf32>, vector<128x128xf32>, vector<1x128xf32> -> vector<1x128xf32>
    %119 = vector.broadcast %118 : vector<1x128xf32> to vector<16x128xf32>
    %120 = arith.addf %113, %119 : vector<16x128xf32>
    %cst_90 = arith.constant 0.000000e+00 : f32
    %121 = vector.broadcast %cst_90 : f32 to vector<16x128xf32>
    %122 = arith.cmpf ogt, %120, %121 : vector<16x128xf32>
    %cst_91 = arith.constant 2.000000e-01 : f32
    %123 = vector.broadcast %cst_91 : f32 to vector<16x128xf32>
    %124 = arith.mulf %123, %120 : vector<16x128xf32>
    %125 = arith.select %122, %120, %124 : vector<16x128xi1>, vector<16x128xf32>
    %126 = arith.addf %125, %0 : vector<16x128xf32>
    %cst_92 = arith.constant dense<0xFF800000> : vector<16xf32>
    %127 = vector.multi_reduction <maximumf>, %126, %cst_92 [1] : vector<16x128xf32> to vector<16xf32>
    %128 = vector.shape_cast %127 : vector<16xf32> to vector<16x1xf32>
    %129 = vector.broadcast %128 : vector<16x1xf32> to vector<16x128xf32>
    %130 = arith.subf %126, %129 : vector<16x128xf32>
    %131 = math.exp %130 : vector<16x128xf32>
    %cst_93 = arith.constant dense<0.000000e+00> : vector<16x8xf32>
    %132 = tpu.matmul %131, %5, %cst_93 {dimension_numbers = #tpu.dot_dimension_numbers<[1], [0], [0], [1], [0, 0, 1, 1], [], []>} : vector<16x128xf32>, vector<128x8xf32>, vector<16x8xf32> -> vector<16x8xf32>
    %cst_94 = arith.constant 1.000000e-30 : f32
    %133 = vector.broadcast %cst_94 : f32 to vector<16x8xf32>
    %134 = arith.maximumf %132, %133 : vector<16x8xf32>
    %135 = tpu.reciprocal %134 : vector<16x8xf32> -> vector<16x8xf32>
    %cst_95 = arith.constant 1.250000e-01 : f32
    %136 = vector.broadcast %cst_95 : f32 to vector<16x8xf32>
    %137 = arith.mulf %135, %136 : vector<16x8xf32>
    %cst_96 = arith.constant dense<0.000000e+00> : vector<16x128xf32>
    %138 = tpu.matmul %137, %4, %cst_96 {dimension_numbers = #tpu.dot_dimension_numbers<[1], [0], [0], [1], [0, 0, 1, 1], [], []>} : vector<16x8xf32>, vector<8x128xf32>, vector<16x128xf32> -> vector<16x128xf32>
    %139 = arith.mulf %131, %138 : vector<16x128xf32>
    %cst_97 = arith.constant dense<0.000000e+00> : vector<16x128xf32>
    %140 = tpu.matmul %139, %115, %cst_97 {dimension_numbers = #tpu.dot_dimension_numbers<[1], [0], [0], [1], [0, 0, 1, 1], [], []>} : vector<16x128xf32>, vector<128x128xf32>, vector<16x128xf32> -> vector<16x128xf32>
    %cst_98 = arith.constant dense<0.000000e+00> : vector<16x16xf32>
    %141 = tpu.matmul %140, %6, %cst_98 {dimension_numbers = #tpu.dot_dimension_numbers<[1], [0], [0], [1], [0, 0, 1, 1], [], []>} : vector<16x128xf32>, vector<128x16xf32>, vector<16x16xf32> -> vector<16x16xf32>
    %c2_99 = arith.constant 2 : index
    %c0_100 = arith.constant 0 : index
    %c0_101 = arith.constant 0 : index
    %142 = vector.load %arg4[%c2_99, %c0_100, %c0_101] : memref<3x1x16xf32, #tpu.memory_space<vmem>>, vector<1x1x16xf32>
    %143 = vector.shape_cast %142 : vector<1x1x16xf32> to vector<1x16xf32>
    %144 = vector.broadcast %143 : vector<1x16xf32> to vector<16x16xf32>
    %145 = arith.addf %141, %144 : vector<16x16xf32>
    %cst_102 = arith.constant 0.000000e+00 : f32
    %146 = vector.broadcast %cst_102 : f32 to vector<16x16xf32>
    %147 = arith.cmpf ogt, %145, %146 : vector<16x16xf32>
    %148 = math.exp %145 : vector<16x16xf32>
    %cst_103 = arith.constant 1.000000e+00 : f32
    %149 = vector.broadcast %cst_103 : f32 to vector<16x16xf32>
    %150 = arith.subf %148, %149 : vector<16x16xf32>
    %151 = arith.select %147, %145, %150 : vector<16x16xi1>, vector<16x16xf32>
    %cst_104 = arith.constant dense<0.000000e+00> : vector<2x16xf32>
    %152 = tpu.matmul %1, %151, %cst_104 {dimension_numbers = #tpu.dot_dimension_numbers<[1], [0], [0], [1], [0, 0, 1, 1], [], []>} : vector<2x16xf32>, vector<16x16xf32>, vector<2x16xf32> -> vector<2x16xf32>
    %c2_105 = arith.constant 2 : index
    %c0_106 = arith.constant 0 : index
    %c0_107 = arith.constant 0 : index
    %153 = vector.load %arg12[%c2_105, %c0_106, %c0_107] : memref<3x2x16xf32, #tpu.memory_space<vmem>>, vector<1x2x16xf32>
    %154 = vector.shape_cast %153 : vector<1x2x16xf32> to vector<2x16xf32>
    %155 = vector.shape_cast %152 : vector<2x16xf32> to vector<1x2x16xf32>
    tpu.vector_store %arg12[%c2_105, %c0_106, %c0_107], %155 {strides = array<i32>} : memref<3x2x16xf32, #tpu.memory_space<vmem>>, vector<1x2x16xf32>,
    %c0_108 = arith.constant 0 : index
    %c0_109 = arith.constant 0 : index
    %156 = vector.load %arg13[%c0_108, %c0_109] : memref<16x16xf32, #tpu.memory_space<vmem>>, vector<16x16xf32>
    tpu.vector_store %arg13[%c0_108, %c0_109], %151 {strides = array<i32>} : memref<16x16xf32, #tpu.memory_space<vmem>>, vector<16x16xf32>,
    return
  }
}

</mosaic_0001>

<bundles_post_ra>
// kernel: gat_forward.1
= control target key start
LH: loop header
LB: loop body
LE: loop exit
PB: predicated region body
PF: predicated region fallthrough
CT: control target
= control target key end

     0   :  { %vm115_vm0 = vcmask 64512   ;;  %s5469_s0 = inlined_call_operand.vmem [shape: f32[16,8], index: 0, kind: input, shape index: {}]   ;;  %s5470_s1 = inlined_call_operand.vmem [shape: f32[3,16,128], index: 1, kind: input, shape index: {}]   ;;  %s5471_s2 = inlined_call_operand.vmem [shape: f32[3,128,8], index: 2, kind: input, shape index: {}]   ;;  %s5472_s3 = inlined_call_operand.vmem [shape: f32[3,1,128], index: 3, kind: input, shape index: {}]   ;;  %s5473_s4 = inlined_call_operand.vmem [shape: f32[3,1,16], index: 4, kind: input, shape index: {}]   ;;  %s5474_s5 = inlined_call_operand.vmem [shape: f32[16,128], index: 5, kind: input, shape index: {}]   ;;  %s5475_s6 = inlined_call_operand.vmem [shape: f32[2,16], index: 6, kind: input, shape index: {}]   ;;  %s5476_s7 = inlined_call_operand.vmem [shape: f32[128,16], index: 7, kind: input, shape index: {}]   ;;  %s5477_s8 = inlined_call_operand.vmem [shape: f32[128,128], index: 8, kind: input, shape index: {}]   ;;  %s5478_s9 = inlined_call_operand.vmem [shape: f32[8,128], index: 9, kind: input, shape index: {}]   ;;  %s5479_s10 = inlined_call_operand.vmem [shape: f32[128,8], index: 10, kind: input, shape index: {}]   ;;  %s5480_s11 = inlined_call_operand.vmem [shape: f32[128,16], index: 11, kind: input, shape index: {}]   ;;  %s5481_s12 = inlined_call_operand.vmem [shape: f32[3,2,16], index: 12, kind: output, shape index: {0}]   ;;  %s5482_s13 = inlined_call_operand.hbm [shape: f32[16,16], index: 13, kind: output, shape index: {1}]  }
   0x1   :  { %v114_v0 = vld [vmem:[%s5470_s1] sm:$0xff]  ;;  %v113_v2 = vld [vmem:[%s5469_s0 + $0x8] sm:$0xff]  ;;  %v212_v3 = vld [vmem:[%s5471_s2 + $0x78] sm:$0xff] }
   0x2   :  { %v112_v1 = vld [vmem:[%s5469_s0] sm:$0xff]  ;;  %3411 = vmatprep.subr.mxu0 %v114_v0  ;;  %v211_v4 = vld [vmem:[%s5471_s2 + $0x70] sm:$0xff]  ;;  %3416 = vmatprep.subr.mxu1 %v212_v3  ;;  %v210_v5 = vld [vmem:[%s5471_s2 + $0x68] sm:$0xff] }
   0x3   :  { %3413 = vmatprep.mubr.msk.f32.mxu0 %vm115_vm0, %v112_v1  ;;  %3412 = vmatpush3.msra.mxu0 %v114_v0  ;;  %v209_v6 = vld [vmem:[%s5471_s2 + $0x60] sm:$0xff] }
   0x4   :  { %3414 = vmatmul.mubr.msk.f32.vlgmr.msra.gmra.mxu0 %vm115_vm0, %v113_v2  ;;  %3417 = vmatpush3.msra.mxu1 %v212_v3 }
   0x5   :  { %3418 = vmatprep.subr.mxu1 %v211_v4 }
   0x6   :  { %3419 = vmatpush3.msra.mxu1 %v211_v4 }
   0x7   :  { %19 = vsyncpa [#allocation3], 0  ;;  %3420 = vmatprep.subr.mxu1 %v210_v5  ;;  %v208_v7 = vld [vmem:[%s5471_s2 + $0x58] sm:$0xff]  ;;  %v207_v8 = vld [vmem:[%s5471_s2 + $0x50] sm:$0xff]  ;;  %vm288_vm1 = vcmask 130048   ;;  %v5483_v38 = vmov 0.0  }
   0x8   :  { %3421 = vmatpush3.msra.mxu1 %v210_v5  ;;  %v206_v9 = vld [vmem:[%s5471_s2 + $0x48] sm:$0xff]  ;;  %v205_v10 = vld [vmem:[%s5471_s2 + $0x40] sm:$0xff]  ;;  %v204_v11 = vld [vmem:[%s5471_s2 + $0x38] sm:$0xff]  ;;  %vm4222_vm2 = vmmov 0   ;;  %vm1076_vm7 = vcmask 123904   ;;  %s4223_s25 = smov [#allocation2]  }
   0x9   :  { %3422 = vmatprep.subr.mxu1 %v209_v6  ;;  %v203_v12 = vld [vmem:[%s5471_s2 + $0x30] sm:$0xff]  ;;  %v202_v13 = vld [vmem:[%s5471_s2 + $0x28] sm:$0xff]  ;;  %v201_v14 = vld [vmem:[%s5471_s2 + $0x20] sm:$0xff]  ;;  %s2919_s26 = sshll.u32 %s4223_s25, 4  ;;  %s2920_s26 = int_to_ptr.vmem [resolvable:$true] %s2919_s26 }
   0xa   :  { %3423 = vmatpush3.msra.mxu1 %v209_v6  ;;  %v200_v15 = vld [vmem:[%s5471_s2 + $0x18] sm:$0xff]  ;;  %v199_v16 = vld [vmem:[%s5471_s2 + $0x10] sm:$0xff]  ;;  %v198_v17 = vld [vmem:[%s5471_s2 + $0x8] sm:$0xff]  ;;  %s4199_s27 = scalar_lea.vmem %s2920_s26, 256  ;;  %p4204_p1 = scmp.lt.s32.totalorder %s2920_s26, %s2920_s26 }
   0xb   :  { %3424 = vmatprep.subr.mxu1 %v208_v7  ;;  %v197_v18 = vld [vmem:[%s5471_s2] sm:$0xff]  ;;  %v4365_v22 = vld [vmem:[%s5476_s7 + $0x8] sm:$0xff]  ;;  %v4370_v23 = vld [vmem:[%s5476_s7 + $0x10] sm:$0xff]  ;;  %p4200_p0 = scmp.ne.s32.totalorder %s2920_s26, %s4199_s27  ;;  %p4205_p2 = scmp.lt.s32.totalorder %s4199_s27, %s4199_s27 }
   0xc   :  { %3425 = vmatpush3.msra.mxu1 %v208_v7  ;;  %v4358_v19 = vld [vmem:[%s5476_s7] sm:$0xff]  ;;  %v4379_v24 = vld [vmem:[%s5476_s7 + $0x18] sm:$0xff]  ;;  %v4393_v26 = vld [vmem:[%s5476_s7 + $0x28] sm:$0xff] }
   0xd   :  { %3426 = vmatprep.subr.mxu1 %v207_v8  ;;  %3455 = vmatprep.mubr.msk.f32.mxu0 %vm288_vm1, %v4358_v19  ;;  %v4384_v25 = vld [vmem:[%s5476_s7 + $0x20] sm:$0xff]  ;;  %v4398_v27 = vld [vmem:[%s5476_s7 + $0x30] sm:$0xff]  ;;  %v4407_v28 = vld [vmem:[%s5476_s7 + $0x38] sm:$0xff]  ;;  %p4206_p3 = por %p4205_p2, %p4204_p1 }
   0xe   :  { %3427 = vmatpush3.msra.mxu1 %v207_v8  ;;  %v4412_v29 = vld [vmem:[%s5476_s7 + $0x40] sm:$0xff]  ;;  %v4421_v30 = vld [vmem:[%s5476_s7 + $0x48] sm:$0xff]  ;;  %v4426_v31 = vld [vmem:[%s5476_s7 + $0x50] sm:$0xff] }
   0xf   :  { %3428 = vmatprep.subr.mxu1 %v206_v9  ;;  %v4435_v32 = vld [vmem:[%s5476_s7 + $0x58] sm:$0xff]  ;;  %v4440_v33 = vld [vmem:[%s5476_s7 + $0x60] sm:$0xff]  ;;  %v4449_v34 = vld [vmem:[%s5476_s7 + $0x68] sm:$0xff]  ;;  %p4207_p4 = pnand %p4206_p3, %p4200_p0 }
  0x10   :  { %3429 = vmatpush3.msra.mxu1 %v206_v9  ;;  %v4454_v35 = vld [vmem:[%s5476_s7 + $0x70] sm:$0xff]  ;;  %v4463_v36 = vld [vmem:[%s5476_s7 + $0x78] sm:$0xff]  ;;  %v4470_v37 = vld [vmem:[%s5478_s9] sm:$0xff] }
  0x11   :  { %3430 = vmatprep.subr.mxu1 %v205_v10  ;;  %v4490_v55 = vld [vmem:[%s5477_s8 + $0x78] sm:$0xff]  ;;  %v4498_v58 = vld [vmem:[%s5477_s8 + $0x70] sm:$0xff]  ;;  %v4506_v61 = vld [vmem:[%s5477_s8 + $0x68] sm:$0xff] }
  0x12   :  { %3431 = vmatpush3.msra.mxu1 %v205_v10  ;;  %v4513_v63 = vld [vmem:[%s5477_s8 + $0x60] sm:$0xff]  ;;  %v4520_v1 = vld [vmem:[%s5477_s8 + $0x58] sm:$0xff]  ;;  %v4527_v3 = vld [vmem:[%s5477_s8 + $0x50] sm:$0xff] }
  0x13   :  { %3432 = vmatprep.subr.mxu1 %v204_v11  ;;  %v4534_v5 = vld [vmem:[%s5477_s8 + $0x48] sm:$0xff]  ;;  %v4541_v7 = vld [vmem:[%s5477_s8 + $0x40] sm:$0xff]  ;;  %v4548_v9 = vld [vmem:[%s5477_s8 + $0x38] sm:$0xff] }
  0x14   :  { %3433 = vmatpush3.msra.mxu1 %v204_v11  ;;  %v4555_v11 = vld [vmem:[%s5477_s8 + $0x30] sm:$0xff] }
  0x15   :  { %3434 = vmatprep.subr.mxu1 %v203_v12 }
  0x16   :  { %3435 = vmatpush3.msra.mxu1 %v203_v12 }
  0x17   :  { %3436 = vmatprep.subr.mxu1 %v202_v13 }
  0x18   :  { %3437 = vmatpush3.msra.mxu1 %v202_v13  ;;  %v4562_v13 = vld [vmem:[%s5477_s8 + $0x28] sm:$0xff] }
  0x19   :  { %3438 = vmatprep.subr.mxu1 %v201_v14 }
  0x1a   :  { %3439 = vmatpush3.msra.mxu1 %v201_v14 }
  0x1b   :  { %3440 = vmatprep.subr.mxu1 %v200_v15 }
  0x1c   :  { %3441 = vmatpush3.msra.mxu1 %v200_v15  ;;  %v4569_v15 = vld [vmem:[%s5477_s8 + $0x20] sm:$0xff] }
  0x1d   :  { %3442 = vmatprep.subr.mxu1 %v199_v16 }
  0x1e   :  { %3443 = vmatpush3.msra.mxu1 %v199_v16 }
  0x1f   :  { %3444 = vmatprep.subr.mxu1 %v198_v17 }
  0x20   :  { %3445 = vmatpush3.msra.mxu1 %v198_v17  ;;  %v4576_v17 = vld [vmem:[%s5477_s8 + $0x18] sm:$0xff] }
  0x21   :  { %3446 = vmatprep.subr.mxu1 %v197_v18 }
  0x22   :  { %3447 = vmatpush3.msra.mxu1 %v197_v18 }
  0x23   :  { %3514 = vmatprep.subr.mxu1 %v4470_v37 }
  0xc4   :  { %v3415_v20 = vpop.f32.mrf.mxu0 }
  0xc5   :  { %3451 = vmatprep.subr.mxu0 %v3415_v20 }
  0xc6   :  { %v188_v21 = vpop.f32.mrf.mxu0  ;;  %3452 = vmatpush3.msra.mxu0 %v3415_v20 }
  0xc7   :  { %3448 = vmatprep.mubr.f32.mxu1 %v188_v21  ;;  %3453 = vmatprep.subr.mxu0 %v188_v21 }
  0xc8   :  { %3449 = vmatmul.mubr.f32.vlgmr.msra.gmra.mxu1 %v3415_v20  ;;  %3454 = vmatpush3.msra.mxu0 %v188_v21  ;;  %v4584_v20 = vld [vmem:[%s5477_s8 + $0x10] sm:$0xff] }
  0xc9   :  { %3456 = vmatmul.mubr.msk.f32.vlgmr.msra.gmra.mxu0 %vm288_vm1, %v4365_v22  ;;  %3515 = vmatpush3.msra.mxu1 %v4470_v37 }
  0xca   :  { %3458 = vmatprep.mubr.msk.f32.mxu0 %vm288_vm1, %v4370_v23  ;;  %3479 = vmatprep.subr.mxu0 %v5483_v38 }
  0xcd   :  { %3459 = vmatmul.mubr.msk.f32.gmra.mxu0 %vm288_vm1, %v4379_v24 }
  0xce   :  { %3461 = vmatprep.mubr.msk.f32.mxu0 %vm288_vm1, %v4384_v25 }
  0xd1   :  { %3462 = vmatmul.mubr.msk.f32.gmra.mxu0 %vm288_vm1, %v4393_v26 }
  0xd2   :  { %3464 = vmatprep.mubr.msk.f32.mxu0 %vm288_vm1, %v4398_v27 }
  0xd5   :  { %3465 = vmatmul.mubr.msk.f32.gmra.mxu0 %vm288_vm1, %v4407_v28 }
  0xd6   :  { %3467 = vmatprep.mubr.msk.f32.mxu0 %vm288_vm1, %v4412_v29 }
  0xd9   :  { %3468 = vmatmul.mubr.msk.f32.gmra.mxu0 %vm288_vm1, %v4421_v30 }
  0xda   :  { %3470 = vmatprep.mubr.msk.f32.mxu0 %vm288_vm1, %v4426_v31 }
  0xdd   :  { %3471 = vmatmul.mubr.msk.f32.gmra.mxu0 %vm288_vm1, %v4435_v32 }
  0xde   :  { %3473 = vmatprep.mubr.msk.f32.mxu0 %vm288_vm1, %v4440_v33 }
  0xe1   :  { %3474 = vmatmul.mubr.msk.f32.gmra.mxu0 %vm288_vm1, %v4449_v34 }
  0xe2   :  { %3476 = vmatprep.mubr.msk.f32.mxu0 %vm288_vm1, %v4454_v35 }
  0xe5   :  { %3477 = vmatmul.mubr.msk.f32.gmra.mxu0 %vm288_vm1, %v4463_v36 }
  0xe6   :  { %3511 = vmatprep.mubr.msk.f32.mxu0 %vm4222_vm2, %v5483_v38 }
 0x188   :  { %v3450_v39 = vpop.f32.mrf.mxu1 }
 0x189   :  { %v4477_v40 = vpop.f32.mrf.mxu0 }
 0x18a   :  { %v279_v41 = vpop.f32.mrf.mxu1 }
 0x18b   :  { %v4479_v42 = vpop.f32.mrf.mxu0  ;;  %3516 = vmatprep.mubr.msk.f32.mxu1 %vm115_vm0, %v279_v41 }
 0x18c   :  { %3517 = vmatmul.mubr.msk.f32.vlgmr.msra.gmra.mxu1 %vm115_vm0, %v3450_v39  ;;  %v4592_v39 = vld [vmem:[%s5477_s8 + $0x8] sm:$0xff] }
 0x18d   :  { %v4483_v43 = vpop.f32.mrf.mxu0  ;;  %v483_v41 = vmul.f32 %v4477_v40, %v4592_v39  ;;  %v4614_v40 = vld [vmem:[%s5479_s10 + $0x78] sm:$0xff] }
 0x18e   :  { %v485_v18 = vmul.f32 %v4483_v43, %v4576_v17  ;;  %v4600_v43 = vld [vmem:[%s5477_s8] sm:$0xff]  ;;  %3519 = vmatprep.subr.mxu1 %v4614_v40 }
 0x18f   :  { %v4485_v44 = vpop.f32.mrf.mxu0  ;;  %3520 = vmatpush3.msra.mxu1 %v4614_v40 }
 0x190   :  { %v484_v21 = vmul.f32 %v4485_v44, %v4584_v20  ;;  %v482_v44 = vmul.f32 %v4479_v42, %v4600_v43  ;;  %v4619_v42 = vld [vmem:[%s5479_s10 + $0x70] sm:$0xff] }
 0x191   :  { %v3463_v45 = vpop.f32.mrf.mxu0  ;;  %3521 = vmatprep.subr.mxu1 %v4619_v42 }
 0x192   :  { %v487_v14 = vmul.f32 %v3463_v45, %v4562_v13  ;;  %v498_v45 = vld [vmem:[%s5472_s3] sm:$0x1]  ;;  %3522 = vmatpush3.msra.mxu1 %v4619_v42 }
 0x193   :  { %v423_v46 = vpop.f32.mrf.mxu0 }
 0x194   :  { %v486_v16 = vmul.f32 %v423_v46, %v4569_v15  ;;  %v4626_v46 = vld [vmem:[%s5479_s10 + $0x68] sm:$0xff] }
 0x195   :  { %v3466_v47 = vpop.f32.mrf.mxu0  ;;  %3523 = vmatprep.subr.mxu1 %v4626_v46 }
 0x196   :  { %v489_v10 = vmul.f32 %v3466_v47, %v4548_v9  ;;  %v4633_v47 = vld [vmem:[%s5479_s10 + $0x60] sm:$0xff]  ;;  %3524 = vmatpush3.msra.mxu1 %v4626_v46 }
 0x197   :  { %v433_v48 = vpop.f32.mrf.mxu0  ;;  %3525 = vmatprep.subr.mxu1 %v4633_v47 }
 0x198   :  { %v488_v12 = vmul.f32 %v433_v48, %v4555_v11  ;;  %v4640_v48 = vld [vmem:[%s5479_s10 + $0x58] sm:$0xff]  ;;  %3526 = vmatpush3.msra.mxu1 %v4633_v47 }
 0x199   :  { %v3469_v49 = vpop.f32.mrf.mxu0  ;;  %3527 = vmatprep.subr.mxu1 %v4640_v48 }
 0x19a   :  { %v491_v6 = vmul.f32 %v3469_v49, %v4534_v5  ;;  %3528 = vmatpush3.msra.mxu1 %v4640_v48  ;;  %v569_v49 = vlaneseq }
 0x19b   :  { %v443_v50 = vpop.f32.mrf.mxu0 }
 0x19c   :  { %v490_v8 = vmul.f32 %v443_v50, %v4541_v7  ;;  %v570_v50 = vshrl.u32 %v569_v49, 7  ;;  %v4711_v49 = vld [vmem:[%s5479_s10 + $0x18] sm:$0xff] }
 0x19d   :  { %v3472_v51 = vpop.f32.mrf.mxu0 }
 0x19e   :  { %v493_v2 = vmul.f32 %v3472_v51, %v4520_v1  ;;  %v4646_v51 = vsub.s32 0, %v570_v50  ;;  %v4718_v50 = vld [vmem:[%s5479_s10 + $0x10] sm:$0xff] }
 0x19f   :  { %v453_v52 = vpop.f32.mrf.mxu0 }
 0x1a0   :  { %v492_v4 = vmul.f32 %v453_v52, %v4527_v3  ;;  %5519 = vst [vmem:[#allocation5_spill] sm:$0xff] %v4646_v51 }
 0x1a1   :  { %v3475_v53 = vpop.f32.mrf.mxu0 }
 0x1a2   :  { %v495_v62 = vmul.f32 %v3475_v53, %v4506_v61 }
 0x1a3   :  { %v463_v54 = vpop.f32.mrf.mxu0 }
 0x1a4   :  { %v494_v0 = vmul.f32 %v463_v54, %v4513_v63 }
 0x1a5   :  { %v3478_v56 = vpop.f32.mrf.mxu0 }
 0x1a6   :  { %v4493_v57 = vmul.f32 %v3478_v56, %v4490_v55 }
 0x1a7   :  { %v473_v59 = vpop.f32.mrf.mxu0 }
 0x1a8   :  { %3480 = vmatpush3.xpose.msra.mxu0 %v4493_v57  ;;  %v496_v60 = vmul.f32 %v473_v59, %v4498_v58 }
 0x1a9   :  { %3481 = vmatprep.subr.mxu0 %v5483_v38 }
 0x1ac   :  { %3482 = vmatpush3.xpose.msra.mxu0 %v496_v60 }
 0x1ad   :  { %3483 = vmatprep.subr.mxu0 %v5483_v38 }
 0x1b0   :  { %3484 = vmatpush3.xpose.msra.mxu0 %v495_v62 }
 0x1b1   :  { %3485 = vmatprep.subr.mxu0 %v5483_v38 }
 0x1b4   :  { %3486 = vmatpush3.xpose.msra.mxu0 %v494_v0 }
 0x1b5   :  { %3487 = vmatprep.subr.mxu0 %v5483_v38 }
 0x1b8   :  { %3488 = vmatpush3.xpose.msra.mxu0 %v493_v2 }
 0x1b9   :  { %3489 = vmatprep.subr.mxu0 %v5483_v38 }
 0x1bc   :  { %3490 = vmatpush3.xpose.msra.mxu0 %v492_v4 }
 0x1bd   :  { %3491 = vmatprep.subr.mxu0 %v5483_v38 }
 0x1c0   :  { %3492 = vmatpush3.xpose.msra.mxu0 %v491_v6 }
 0x1c1   :  { %3493 = vmatprep.subr.mxu0 %v5483_v38 }
 0x1c4   :  { %3494 = vmatpush3.xpose.msra.mxu0 %v490_v8 }
 0x1c5   :  { %3495 = vmatprep.subr.mxu0 %v5483_v38 }
 0x1c8   :  { %3496 = vmatpush3.xpose.msra.mxu0 %v489_v10 }
 0x1c9   :  { %3497 = vmatprep.subr.mxu0 %v5483_v38 }
 0x1cc   :  { %3498 = vmatpush3.xpose.msra.mxu0 %v488_v12 }
 0x1cd   :  { %3499 = vmatprep.subr.mxu0 %v5483_v38 }
 0x1d0   :  { %3500 = vmatpush3.xpose.msra.mxu0 %v487_v14 }
 0x1d1   :  { %3501 = vmatprep.subr.mxu0 %v5483_v38 }
 0x1d4   :  { %3502 = vmatpush3.xpose.msra.mxu0 %v486_v16 }
 0x1d5   :  { %3503 = vmatprep.subr.mxu0 %v5483_v38 }
 0x1d8   :  { %3504 = vmatpush3.xpose.msra.mxu0 %v485_v18 }
 0x1d9   :  { %3505 = vmatprep.subr.mxu0 %v5483_v38 }
 0x1dc   :  { %3506 = vmatpush3.xpose.msra.mxu0 %v484_v21 }
 0x1dd   :  { %3507 = vmatprep.subr.mxu0 %v5483_v38 }
 0x1e0   :  { %3508 = vmatpush3.xpose.msra.mxu0 %v483_v41 }
 0x1e1   :  { %3509 = vmatprep.subr.mxu0 %v5483_v38 }
 0x1e4   :  { %3510 = vmatpush3.xpose.msra.mxu0 %v482_v44 }
 0x1e5   :  { %3559 = vmatprep.subr.mxu0 %v4493_v57 }
 0x1e7   :  { %3512 = vmatmul.mubr.f32.vlgmr.msra.gmra.mxu0 %v498_v45  ;;  %v4704_v45 = vld [vmem:[%s5479_s10 + $0x20] sm:$0xff] }
 0x1e8   :  { %3560 = vmatpush3.msra.mxu0 %v4493_v57 }
 0x1e9   :  { %3561 = vmatprep.subr.mxu0 %v496_v60 }
 0x1ea   :  { %3562 = vmatpush3.msra.mxu0 %v496_v60 }
 0x1eb   :  { %3563 = vmatprep.subr.mxu0 %v495_v62 }
 0x1ec   :  { %3564 = vmatpush3.msra.mxu0 %v495_v62  ;;  %v4652_v62 = vld [vmem:[%s5474_s5] sm:$0xff] }
 0x1ed   :  { %3565 = vmatprep.subr.mxu0 %v494_v0  ;;  %5520 = vst [vmem:[#allocation6_spill] sm:$0xff] %v4652_v62 }
 0x1ee   :  { %3566 = vmatpush3.msra.mxu0 %v494_v0 }
 0x1ef   :  { %3567 = vmatprep.subr.mxu0 %v493_v2 }
 0x1f0   :  { %3568 = vmatpush3.msra.mxu0 %v493_v2 }
 0x1f1   :  { %3569 = vmatprep.subr.mxu0 %v492_v4 }
 0x1f2   :  { %3570 = vmatpush3.msra.mxu0 %v492_v4 }
 0x1f3   :  { %3571 = vmatprep.subr.mxu0 %v491_v6 }
 0x1f4   :  { %3572 = vmatpush3.msra.mxu0 %v491_v6 }
 0x1f5   :  { %3573 = vmatprep.subr.mxu0 %v490_v8 }
 0x1f6   :  { %3574 = vmatpush3.msra.mxu0 %v490_v8  ;;  %v4658_v8 = vld [vmem:[%s5474_s5 + $0x8] sm:$0xff] }
 0x1f7   :  { %3575 = vmatprep.subr.mxu0 %v489_v10  ;;  %5521 = vst [vmem:[#allocation7_spill] sm:$0xff] %v4658_v8 }
 0x1f8   :  { %3576 = vmatpush3.msra.mxu0 %v489_v10 }
 0x1f9   :  { %3577 = vmatprep.subr.mxu0 %v488_v12 }
 0x1fa   :  { %3578 = vmatpush3.msra.mxu0 %v488_v12 }
 0x1fb   :  { %3579 = vmatprep.subr.mxu0 %v487_v14 }
 0x1fc   :  { %3580 = vmatpush3.msra.mxu0 %v487_v14  ;;  %v4664_v14 = vld [vmem:[%s5479_s10 + $0x50] sm:$0xff] }
 0x1fd   :  { %3581 = vmatprep.subr.mxu0 %v486_v16  ;;  %3529 = vmatprep.subr.mxu1 %v4664_v14 }
 0x1fe   :  { %3582 = vmatpush3.msra.mxu0 %v486_v16  ;;  %3530 = vmatpush3.msra.mxu1 %v4664_v14  ;;  %v4671_v16 = vld [vmem:[%s5479_s10 + $0x48] sm:$0xff] }
 0x1ff   :  { %3583 = vmatprep.subr.mxu0 %v485_v18  ;;  %3531 = vmatprep.subr.mxu1 %v4671_v16 }
 0x200   :  { %3584 = vmatpush3.msra.mxu0 %v485_v18  ;;  %3532 = vmatpush3.msra.mxu1 %v4671_v16  ;;  %v4678_v18 = vld [vmem:[%s5479_s10 + $0x40] sm:$0xff] }
 0x201   :  { %3585 = vmatprep.subr.mxu0 %v484_v21  ;;  %3533 = vmatprep.subr.mxu1 %v4678_v18 }
 0x202   :  { %3586 = vmatpush3.msra.mxu0 %v484_v21  ;;  %3534 = vmatpush3.msra.mxu1 %v4678_v18  ;;  %v4685_v21 = vld [vmem:[%s5479_s10 + $0x38] sm:$0xff] }
 0x203   :  { %3587 = vmatprep.subr.mxu0 %v483_v41  ;;  %3535 = vmatprep.subr.mxu1 %v4685_v21 }
 0x204   :  { %3588 = vmatpush3.msra.mxu0 %v483_v41  ;;  %3536 = vmatpush3.msra.mxu1 %v4685_v21  ;;  %v4692_v41 = vld [vmem:[%s5479_s10 + $0x30] sm:$0xff] }
 0x205   :  { %3589 = vmatprep.subr.mxu0 %v482_v44  ;;  %3537 = vmatprep.subr.mxu1 %v4692_v41 }
 0x206   :  { %3590 = vmatpush3.msra.mxu0 %v482_v44  ;;  %v4698_v44 = vld [vmem:[%s5479_s10 + $0x28] sm:$0xff]  ;;  %3538 = vmatpush3.msra.mxu1 %v4692_v41 }
 0x207   :  { %3629 = vmatprep.subr.mxu0 %v5483_v38  ;;  %3539 = vmatprep.subr.mxu1 %v4698_v44 }
 0x208   :  { %3540 = vmatpush3.msra.mxu1 %v4698_v44 }
 0x209   :  { %3541 = vmatprep.subr.mxu1 %v4704_v45 }
 0x20a   :  { %3542 = vmatpush3.msra.mxu1 %v4704_v45 }
 0x20b   :  { %3543 = vmatprep.subr.mxu1 %v4711_v49 }
 0x20c   :  { %3544 = vmatpush3.msra.mxu1 %v4711_v49 }
 0x20d   :  { %3545 = vmatprep.subr.mxu1 %v4718_v50 }
 0x20e   :  { %3546 = vmatpush3.msra.mxu1 %v4718_v50 }
 0x24c   :  { %v3518_v52 = vpop.f32.mrf.mxu1 }
 0x24e   :  { %v645_v56 = vpop.f32.mrf.mxu1 }
 0x2a7   :  { %v565_v53 = vpop.f32.mrf.mxu0 }
 0x2a8   :  { %v572_v54 = vrot.slane %v565_v53, %v4646_v51  ;;  %v4733_v53 = vld [vmem:[%s5479_s10] sm:$0xff] }
 0x2a9   :  { %v3513_v57 = vpop.f32.mrf.mxu0 }
 0x2aa   :  { %v646_v59 = vadd.f32 %v645_v56, %v572_v54  ;;  %v651_v60 = vadd.f32 %v3518_v52, %v572_v54  ;;  %v4725_v52 = vld [vmem:[%s5479_s10 + $0x8] sm:$0xff] }
 0x2ab   :  { %3547 = vmatprep.subr.mxu1 %v4725_v52 }
 0x2ac   :  { %vm654_vm3 = vcmp.gt.f32.partialorder %v646_v59, 0.0  ;;  %v656_v0 = vmul.f32 0.2, %v646_v59  ;;  %v657_v2 = vmul.f32 0.2, %v651_v60  ;;  %vm655_vm4 = vcmp.gt.f32.partialorder %v651_v60, 0.0  ;;  %3548 = vmatpush3.msra.mxu1 %v4725_v52 }
 0x2ad   :  { %3549 = vmatprep.subr.mxu1 %v4733_v53 }
 0x2ae   :  { %v658_v4 = vsel %vm654_vm3, %v646_v59, %v656_v0  ;;  %v659_v10 = vsel %vm655_vm4, %v651_v60, %v657_v2  ;;  %3550 = vmatpush3.msra.mxu1 %v4733_v53 }
 0x2af   :  { %v660_v6 = vadd.f32 %v658_v4, %v4652_v62  ;;  %v661_v12 = vadd.f32 %v659_v10, %v4658_v8  ;;  %3554 = vmatprep.subr.mxu1 %v4470_v37 }
 0x2b1   :  { %662 = vmax.xlane.f32.xlu0 %v660_v6 }
 0x2b5   :  { %664 = vmax.xlane.f32.xlu0 %v661_v12 }
 0x33a   :  { %v663_v54 = vpop.xlane.xlu0 %662 }
 0x33b   :  { %v666_v56 = vsub.f32 %v660_v6, %v663_v54 }
 0x33d   :  { %v668_v57 = vmul.f32 1.442695, %v666_v56 }
 0x33e   :  { %v665_v59 = vpop.xlane.xlu0 %664 }
 0x33f   :  { %4095 = vpow2.f32 %v668_v57  ;;  %v667_v60 = vsub.f32 %v661_v12, %v665_v59  ;;  %v4745_v12 = vld [vmem:[%s5480_s11 + $0x78] sm:$0xff]  ;;  %v4750_v57 = vld [vmem:[%s5480_s11 + $0x70] sm:$0xff]  ;;  %v4785_v59 = vld [vmem:[%s5480_s11 + $0x48] sm:$0xff] }
 0x340   :  { %5522 = vst [vmem:[#allocation8_spill] sm:$0xff] %v4750_v57  ;;  %5527 = vst [vmem:[#allocation13_spill] sm:$0xff] %v4785_v59 }
 0x341   :  { %v670_v0 = vmul.f32 1.442695, %v667_v60  ;;  %v4792_v60 = vld [vmem:[%s5480_s11 + $0x40] sm:$0xff] }
 0x342   :  { %5528 = vst [vmem:[#allocation14_spill] sm:$0xff] %v4792_v60 }
 0x343   :  { %4097 = vpow2.f32 %v670_v0  ;;  %v4799_v0 = vld [vmem:[%s5480_s11 + $0x38] sm:$0xff] }
 0x344   :  { %5529 = vst [vmem:[#allocation15_spill] sm:$0xff] %v4799_v0 }
 0x34c   :  { %v4096_v2 = vpop.eup %4095 }
 0x34d   :  { %3551 = vmatprep.mubr.f32.mxu1 %v4096_v2 }
 0x350   :  { %v4098_v4 = vpop.eup %4097 }
 0x351   :  { %3552 = vmatmul.mubr.f32.vlgmr.msra.gmra.mxu1 %v4098_v4 }
 0x352   :  { %3555 = vmatpush3.msra.mxu1 %v4470_v37 }
 0x353   :  { %3594 = vmatprep.subr.mxu1 %v4745_v12 }
 0x411   :  { %v3553_v10 = vpop.f32.mrf.mxu1 }
 0x412   :  { %v748_v38 = vmax.f32 %v3553_v10, 1e-30  ;;  %v4806_v10 = vld [vmem:[%s5480_s11 + $0x30] sm:$0xff] }
 0x413   :  { %v738_v8 = vpop.f32.mrf.mxu1  ;;  %5530 = vst [vmem:[#allocation16_spill] sm:$0xff] %v4806_v10 }
 0x414   :  { %v747_v62 = vmax.f32 %v738_v8, 1e-30  ;;  %4099 = vrcp.f32 %v748_v38  ;;  %v4757_v38 = vld [vmem:[%s5480_s11 + $0x68] sm:$0xff]  ;;  %v4778_v8 = vld [vmem:[%s5480_s11 + $0x50] sm:$0xff] }
 0x415   :  { %5523 = vst [vmem:[#allocation9_spill] sm:$0xff] %v4757_v38  ;;  %5526 = vst [vmem:[#allocation12_spill] sm:$0xff] %v4778_v8 }
 0x416   :  { %4101 = vrcp.f32 %v747_v62  ;;  %v4771_v62 = vld [vmem:[%s5480_s11 + $0x58] sm:$0xff] }
 0x417   :  { %5525 = vst [vmem:[#allocation11_spill] sm:$0xff] %v4771_v62 }
 0x421   :  { %v4100_v51 = vpop.eup %4099 }
 0x422   :  { %v752_v56 = vmul.f32 0.125, %v4100_v51  ;;  %v4764_v51 = vld [vmem:[%s5480_s11 + $0x60] sm:$0xff] }
 0x423   :  { %v4102_v6 = vpop.eup %4101  ;;  %5524 = vst [vmem:[#allocation10_spill] sm:$0xff] %v4764_v51 }
 0x424   :  { %v751_v54 = vmul.f32 0.125, %v4102_v6  ;;  %v4813_v6 = vld [vmem:[%s5480_s11 + $0x28] sm:$0xff] }
 0x425   :  { %5531 = vst [vmem:[#allocation17_spill] sm:$0xff] %v4813_v6 }
 0x426   :  { %3556 = vmatprep.mubr.msk.f32.mxu1 %vm115_vm0, %v751_v54  ;;  %v4820_v54 = vld [vmem:[%s5480_s11 + $0x20] sm:$0xff] }
 0x427   :  { %3557 = vmatmul.mubr.msk.f32.vlgmr.msra.gmra.mxu1 %vm115_vm0, %v752_v56  ;;  %5532 = vst [vmem:[#allocation18_spill] sm:$0xff] %v4820_v54  ;;  %v4827_v56 = vld [vmem:[%s5480_s11 + $0x18] sm:$0xff] }
 0x428   :  { %3595 = vmatpush3.msra.mxu1 %v4745_v12  ;;  %5533 = vst [vmem:[#allocation19_spill] sm:$0xff] %v4827_v56 }
 0x429   :  { %3596 = vmatprep.subr.mxu1 %v4750_v57 }
 0x42a   :  { %3597 = vmatpush3.msra.mxu1 %v4750_v57 }
 0x42b   :  { %3598 = vmatprep.subr.mxu1 %v4757_v38 }
 0x42c   :  { %3599 = vmatpush3.msra.mxu1 %v4757_v38 }
 0x42d   :  { %3600 = vmatprep.subr.mxu1 %v4764_v51 }
 0x42e   :  { %3601 = vmatpush3.msra.mxu1 %v4764_v51 }
 0x42f   :  { %3602 = vmatprep.subr.mxu1 %v4771_v62 }
 0x430   :  { %3603 = vmatpush3.msra.mxu1 %v4771_v62 }
 0x431   :  { %3604 = vmatprep.subr.mxu1 %v4778_v8 }
 0x432   :  { %3605 = vmatpush3.msra.mxu1 %v4778_v8  ;;  %v4845_v8 = vld [vmem:[%s5480_s11 + $0x8] sm:$0xff] }
 0x433   :  { %3606 = vmatprep.subr.mxu1 %v4785_v59  ;;  %5536 = vst [vmem:[#allocation21_spill] sm:$0xff] %v4845_v8 }
 0x434   :  { %3607 = vmatpush3.msra.mxu1 %v4785_v59 }
 0x435   :  { %3608 = vmatprep.subr.mxu1 %v4792_v60 }
 0x436   :  { %3609 = vmatpush3.msra.mxu1 %v4792_v60 }
 0x437   :  { %3610 = vmatprep.subr.mxu1 %v4799_v0 }
 0x438   :  { %3611 = vmatpush3.msra.mxu1 %v4799_v0 }
 0x439   :  { %3612 = vmatprep.subr.mxu1 %v4806_v10 }
 0x43a   :  { %3613 = vmatpush3.msra.mxu1 %v4806_v10  ;;  %v4834_v10 = vld [vmem:[%s5480_s11 + $0x10] sm:$0xff] }
 0x43b   :  { %3614 = vmatprep.subr.mxu1 %v4813_v6  ;;  %5534 = vst [vmem:[#allocation20_spill] sm:$0xff] %v4834_v10 }
 0x43c   :  { %3615 = vmatpush3.msra.mxu1 %v4813_v6 }
 0x43d   :  { %3616 = vmatprep.subr.mxu1 %v4820_v54 }
 0x43e   :  { %3617 = vmatpush3.msra.mxu1 %v4820_v54  ;;  %v5535_v54 = vmov 0.0  }
 0x43f   :  { %3618 = vmatprep.subr.mxu1 %v4827_v56 }
 0x440   :  { %3619 = vmatpush3.msra.mxu1 %v4827_v56 }
 0x441   :  { %3620 = vmatprep.subr.mxu1 %v4834_v10 }
 0x442   :  { %3621 = vmatpush3.msra.mxu1 %v4834_v10  ;;  %v4852_v10 = vld [vmem:[%s5480_s11] sm:$0xff] }
 0x443   :  { %3622 = vmatprep.subr.mxu1 %v4845_v8  ;;  %5537 = vst [vmem:[#allocation22_spill] sm:$0xff] %v4852_v10 }
 0x444   :  { %3623 = vmatpush3.msra.mxu1 %v4845_v8 }
 0x445   :  { %3624 = vmatprep.subr.mxu1 %v4852_v10 }
 0x446   :  { %3625 = vmatpush3.msra.mxu1 %v4852_v10 }
 0x4e7   :  { %v3558_v6 = vpop.f32.mrf.mxu1 }
 0x4e8   :  { %v835_v59 = vmul.f32 %v4098_v4, %v3558_v6 }
 0x4e9   :  { %v825_v0 = vpop.f32.mrf.mxu1 }
 0x4ea   :  { %v834_v60 = vmul.f32 %v4096_v2, %v825_v0  ;;  %v2954_v0 = vld [vmem:[%s5473_s4] ss:$0 sm:$0xff] }
 0x4ec   :  { %3591 = vmatprep.mubr.f32.mxu0 %v834_v60  ;;  %v2958_v60 = vld [vmem:[%s5470_s1 + $0x10] sm:$0xff] }
 0x4ed   :  { %3592 = vmatmul.mubr.f32.vlgmr.msra.gmra.mxu0 %v835_v59  ;;  %v2959_v59 = vld [vmem:[%s5470_s1 + $0x18] sm:$0xff] }
 0x4ee   :  { %3633 = vmatprep.mubr.msk.f32.mxu0 %vm4222_vm2, %v5535_v54  ;;  %3636 = vmatprep.subr.mxu1 %v2959_v59 }
 0x5ad   :  { %v3593_v2 = vpop.f32.mrf.mxu0 }
 0x5af   :  { %v902_v4 = vpop.f32.mrf.mxu0 }
 0x5b0   :  { %3626 = vmatprep.mubr.f32.mxu1 %v902_v4 }
 0x5b1   :  { %3627 = vmatmul.mubr.f32.vlgmr.msra.gmra.mxu1 %v3593_v2 }
 0x5b2   :  { %3637 = vmatpush3.msra.mxu1 %v2959_v59 }
 0x5b3   :  { %3638 = vmatprep.subr.mxu1 %v2958_v60 }
 0x5b4   :  { %3639 = vmatpush3.msra.mxu1 %v2958_v60  ;;  %v2977_v60 = vld [vmem:[%s5471_s2 + $0xf8] sm:$0xff] }
 0x671   :  { %v3628_v6 = vpop.f32.mrf.mxu1 }
 0x672   :  { %v990_v10 = vadd.f32 %v3628_v6, %v2954_v0 }
 0x673   :  { %v984_v4 = vpop.f32.mrf.mxu1 }
 0x674   :  { %v997_v2 = vmul.f32 1.442695, %v990_v10  ;;  %v985_v8 = vadd.f32 %v2954_v0, %v984_v4  ;;  %vm994_vm5 = vcmp.gt.f32.partialorder %v990_v10, 0.0  ;;  %v4872_v0 = vld [vmem:[%s5475_s6] sm:$0x3]  ;;  %v2968_v4 = vld [vmem:[%s5471_s2 + $0xb0] sm:$0xff] }
 0x676   :  { %4103 = vpow2.f32 %v997_v2  ;;  %v995_v56 = vmul.f32 1.442695, %v985_v8  ;;  %vm993_vm6 = vcmp.gt.f32.partialorder %v985_v8, 0.0  ;;  %v2967_v2 = vld [vmem:[%s5471_s2 + $0xa8] sm:$0xff] }
 0x678   :  { %4105 = vpow2.f32 %v995_v56  ;;  %v2969_v56 = vld [vmem:[%s5471_s2 + $0xb8] sm:$0xff] }
 0x683   :  { %v4104_v62 = vpop.eup %4103 }
 0x684   :  { %v2956_v59 = vadd.f32 -1.0, %v4104_v62  ;;  %v2973_v62 = vld [vmem:[%s5471_s2 + $0xd8] sm:$0xff] }
 0x685   :  { %v4106_v51 = vpop.eup %4105 }
 0x686   :  { %v1002_v38 = vsel %vm994_vm5, %v990_v10, %v2956_v59  ;;  %v2955_v57 = vadd.f32 -1.0, %v4106_v51  ;;  %v2976_v51 = vld [vmem:[%s5471_s2 + $0xf0] sm:$0xff]  ;;  %v2970_v10 = vld [vmem:[%s5471_s2 + $0xc0] sm:$0xff] }
 0x687   :  { %3630 = vmatpush3.msra.mxu0 %v1002_v38  ;;  %v2966_v59 = vld [vmem:[%s5471_s2 + $0xa0] sm:$0xff] }
 0x688   :  { %3631 = vmatprep.subr.mxu0 %v5535_v54  ;;  %v1001_v6 = vsel %vm993_vm6, %v985_v8, %v2955_v57  ;;  %v2975_v57 = vld [vmem:[%s5471_s2 + $0xe8] sm:$0xff] }
 0x689   :  { %3632 = vmatpush3.msra.mxu0 %v1001_v6  ;;  %3640 = vmatprep.mubr.msk.f32.mxu1 %vm288_vm1, %v1001_v6  ;;  %v2971_v8 = vld [vmem:[%s5471_s2 + $0xc8] sm:$0xff]  ;;  %v2964_v6 = vld [vmem:[%s5471_s2 + $0x90] sm:$0xff] }
 0x68a   :  { %3641 = vmatmul.mubr.msk.f32.vlgmr.msra.gmra.mxu1 %vm288_vm1, %v1002_v38  ;;  %3643 = vmatprep.subr.mxu0 %v2977_v60  ;;  %v2974_v38 = vld [vmem:[%s5471_s2 + $0xe0] sm:$0xff] }
 0x68b   :  { %3634 = vmatmul.mubr.msk.f32.vlgmr.msra.gmra.mxu0 %vm288_vm1, %v4872_v0  ;;  %3682 = vmatprep.mubr.msk.f32.mxu1 %vm288_vm1, %v4358_v19  ;;  %v2972_v19 = vld [vmem:[%s5471_s2 + $0xd0] sm:$0xff] }
 0x68c   :  { %3644 = vmatpush3.msra.mxu0 %v2977_v60  ;;  %v2965_v60 = vld [vmem:[%s5471_s2 + $0x98] sm:$0xff] }
 0x68d   :  { %3645 = vmatprep.subr.mxu0 %v2976_v51 }
 0x68e   :  { %3646 = vmatpush3.msra.mxu0 %v2976_v51  ;;  %v2963_v51 = vld [vmem:[%s5471_s2 + $0x88] sm:$0xff] }
 0x68f   :  { %3647 = vmatprep.subr.mxu0 %v2975_v57 }
 0x690   :  { %3648 = vmatpush3.msra.mxu0 %v2975_v57  ;;  %v2962_v57 = vld [vmem:[%s5471_s2 + $0x80] sm:$0xff] }
 0x691   :  { %3649 = vmatprep.subr.mxu0 %v2974_v38 }
 0x692   :  { %3650 = vmatpush3.msra.mxu0 %v2974_v38 }
 0x693   :  { %3651 = vmatprep.subr.mxu0 %v2973_v62 }
 0x694   :  { %3652 = vmatpush3.msra.mxu0 %v2973_v62 }
 0x695   :  { %3653 = vmatprep.subr.mxu0 %v2972_v19 }
 0x696   :  { %3654 = vmatpush3.msra.mxu0 %v2972_v19 }
 0x697   :  { %3655 = vmatprep.subr.mxu0 %v2971_v8 }
 0x698   :  { %3656 = vmatpush3.msra.mxu0 %v2971_v8 }
 0x699   :  { %3657 = vmatprep.subr.mxu0 %v2970_v10 }
 0x69a   :  { %3658 = vmatpush3.msra.mxu0 %v2970_v10 }
 0x69b   :  { %3659 = vmatprep.subr.mxu0 %v2969_v56 }
 0x69c   :  { %3660 = vmatpush3.msra.mxu0 %v2969_v56  ;;  %v5540_v56 = vld [vmem:[#allocation7_spill] sm:$0xff] }
 0x69d   :  { %3661 = vmatprep.subr.mxu0 %v2968_v4 }
 0x69e   :  { %3662 = vmatpush3.msra.mxu0 %v2968_v4 }
 0x69f   :  { %3663 = vmatprep.subr.mxu0 %v2967_v2 }
 0x6a0   :  { %3664 = vmatpush3.msra.mxu0 %v2967_v2 }
 0x6a1   :  { %3665 = vmatprep.subr.mxu0 %v2966_v59 }
 0x6a2   :  { %3666 = vmatpush3.msra.mxu0 %v2966_v59 }
 0x6a3   :  { %3667 = vmatprep.subr.mxu0 %v2965_v60 }
 0x6a4   :  { %3668 = vmatpush3.msra.mxu0 %v2965_v60 }
 0x6a5   :  { %3669 = vmatprep.subr.mxu0 %v2964_v6 }
 0x6a6   :  { %3670 = vmatpush3.msra.mxu0 %v2964_v6 }
 0x6a7   :  { %3671 = vmatprep.subr.mxu0 %v2963_v51 }
 0x6a8   :  { %3672 = vmatpush3.msra.mxu0 %v2963_v51 }
 0x6a9   :  { %3673 = vmatprep.subr.mxu0 %v2962_v57 }
 0x6aa   :  { %3674 = vmatpush3.msra.mxu0 %v2962_v57 }
 0x6ab   :  { %3741 = vmatprep.subr.mxu0 %v4470_v37 }
 0x74a   :  { %v3642_v38 = vpop.f32.mrf.mxu1 }
 0x74b   :  { %3678 = vmatprep.subr.mxu1 %v3642_v38  ;;  %v1072_v62 = vpop.f32.mrf.mxu0 }
 0x74c   :  { %v1153_v19 = vpop.f32.mrf.mxu1  ;;  %3679 = vmatpush3.msra.mxu1 %v3642_v38  ;;  %1077 = vst.msk [vmem:[%s5481_s12] sm:$0x3] %vm1076_vm7, %v1072_v62 }
 0x74d   :  { %3675 = vmatprep.mubr.f32.mxu0 %v1153_v19  ;;  %3680 = vmatprep.subr.mxu1 %v1153_v19  ;;  %v3635_v8 = vpop.f32.mrf.mxu0 }
 0x74e   :  { %3676 = vmatmul.mubr.f32.vlgmr.msra.gmra.mxu0 %v3642_v38  ;;  %3681 = vmatpush3.msra.mxu1 %v1153_v19  ;;  %v5058_v19 = vld [vmem:[%s5478_s9] sm:$0xff] }
 0x74f   :  { %3683 = vmatmul.mubr.msk.f32.vlgmr.msra.gmra.mxu1 %vm288_vm1, %v4365_v22  ;;  %3742 = vmatpush3.msra.mxu0 %v4470_v37 }
 0x750   :  { %3685 = vmatprep.mubr.msk.f32.mxu1 %vm288_vm1, %v4370_v23  ;;  %3706 = vmatprep.subr.mxu1 %v5535_v54 }
 0x751   :  { %3746 = vmatprep.subr.mxu0 %v4614_v40 }
 0x753   :  { %3686 = vmatmul.mubr.msk.f32.gmra.mxu1 %vm288_vm1, %v4379_v24 }
 0x754   :  { %3688 = vmatprep.mubr.msk.f32.mxu1 %vm288_vm1, %v4384_v25 }
 0x757   :  { %3689 = vmatmul.mubr.msk.f32.gmra.mxu1 %vm288_vm1, %v4393_v26 }
 0x758   :  { %3691 = vmatprep.mubr.msk.f32.mxu1 %vm288_vm1, %v4398_v27 }
 0x75b   :  { %3692 = vmatmul.mubr.msk.f32.gmra.mxu1 %vm288_vm1, %v4407_v28 }
 0x75c   :  { %3694 = vmatprep.mubr.msk.f32.mxu1 %vm288_vm1, %v4412_v29 }
 0x75f   :  { %3695 = vmatmul.mubr.msk.f32.gmra.mxu1 %vm288_vm1, %v4421_v30 }
 0x760   :  { %3697 = vmatprep.mubr.msk.f32.mxu1 %vm288_vm1, %v4426_v31 }
 0x763   :  { %3698 = vmatmul.mubr.msk.f32.gmra.mxu1 %vm288_vm1, %v4435_v32 }
 0x764   :  { %3700 = vmatprep.mubr.msk.f32.mxu1 %vm288_vm1, %v4440_v33 }
 0x767   :  { %3701 = vmatmul.mubr.msk.f32.gmra.mxu1 %vm288_vm1, %v4449_v34 }
 0x768   :  { %3703 = vmatprep.mubr.msk.f32.mxu1 %vm288_vm1, %v4454_v35 }
 0x76b   :  { %3704 = vmatmul.mubr.msk.f32.gmra.mxu1 %vm288_vm1, %v4463_v36 }
 0x76c   :  { %3738 = vmatprep.mubr.msk.f32.mxu1 %vm4222_vm2, %v5535_v54 }
 0x80e   :  { %v3677_v22 = vpop.f32.mrf.mxu0 }
 0x80f   :  { %v4965_v23 = vpop.f32.mrf.mxu1 }
 0x810   :  { %v1245_v24 = vpop.f32.mrf.mxu0 }
 0x811   :  { %v4967_v25 = vpop.f32.mrf.mxu1  ;;  %3743 = vmatprep.mubr.msk.f32.mxu0 %vm115_vm0, %v1245_v24 }
 0x812   :  { %3744 = vmatmul.mubr.msk.f32.vlgmr.msra.gmra.mxu0 %vm115_vm0, %v3677_v22 }
 0x813   :  { %v4971_v26 = vpop.f32.mrf.mxu1  ;;  %3747 = vmatpush3.msra.mxu0 %v4614_v40 }
 0x814   :  { %3748 = vmatprep.subr.mxu0 %v4619_v42 }
 0x815   :  { %v4975_v27 = vpop.f32.mrf.mxu1  ;;  %3749 = vmatpush3.msra.mxu0 %v4619_v42 }
 0x816   :  { %3750 = vmatprep.subr.mxu0 %v4626_v46 }
 0x817   :  { %v4979_v28 = vpop.f32.mrf.mxu1  ;;  %3751 = vmatpush3.msra.mxu0 %v4626_v46 }
 0x818   :  { %3752 = vmatprep.subr.mxu0 %v4633_v47 }
 0x819   :  { %v4983_v29 = vpop.f32.mrf.mxu1  ;;  %3753 = vmatpush3.msra.mxu0 %v4633_v47 }
 0x81a   :  { %3754 = vmatprep.subr.mxu0 %v4640_v48 }
 0x81b   :  { %v3693_v30 = vpop.f32.mrf.mxu1  ;;  %3755 = vmatpush3.msra.mxu0 %v4640_v48 }
 0x81c   :  { %3756 = vmatprep.subr.mxu0 %v4664_v14 }
 0x81d   :  { %v1350_v31 = vpop.f32.mrf.mxu1  ;;  %3757 = vmatpush3.msra.mxu0 %v4664_v14 }
 0x81e   :  { %3758 = vmatprep.subr.mxu0 %v4671_v16 }
 0x81f   :  { %v3696_v32 = vpop.f32.mrf.mxu1  ;;  %3759 = vmatpush3.msra.mxu0 %v4671_v16 }
 0x820   :  { %3760 = vmatprep.subr.mxu0 %v4678_v18 }
 0x821   :  { %v1360_v33 = vpop.f32.mrf.mxu1  ;;  %3761 = vmatpush3.msra.mxu0 %v4678_v18 }
 0x822   :  { %3762 = vmatprep.subr.mxu0 %v4685_v21 }
 0x823   :  { %v3699_v34 = vpop.f32.mrf.mxu1  ;;  %3763 = vmatpush3.msra.mxu0 %v4685_v21 }
 0x824   :  { %3764 = vmatprep.subr.mxu0 %v4692_v41 }
 0x825   :  { %v1370_v35 = vpop.f32.mrf.mxu1  ;;  %3765 = vmatpush3.msra.mxu0 %v4692_v41 }
 0x826   :  { %3766 = vmatprep.subr.mxu0 %v4698_v44  ;;  %v1409_v16 = vmul.f32 %v1370_v35, %v4527_v3  ;;  %v1404_v3 = vmul.f32 %v4979_v28, %v4562_v13  ;;  %v1399_v13 = vmul.f32 %v4967_v25, %v4600_v43  ;;  %v5548_v35 = vld [vmem:[#allocation15_spill] sm:$0xff] }
 0x827   :  { %v3702_v36 = vpop.f32.mrf.mxu1  ;;  %3767 = vmatpush3.msra.mxu0 %v4698_v44 }
 0x828   :  { %3768 = vmatprep.subr.mxu0 %v4704_v45 }
 0x829   :  { %v1380_v40 = vpop.f32.mrf.mxu1  ;;  %3769 = vmatpush3.msra.mxu0 %v4704_v45 }
 0x82a   :  { %3770 = vmatprep.subr.mxu0 %v4711_v49  ;;  %v1411_v14 = vmul.f32 %v1380_v40, %v4513_v63  ;;  %v1406_v63 = vmul.f32 %v3693_v30, %v4548_v9  ;;  %v1401_v9 = vmul.f32 %v4975_v27, %v4584_v20  ;;  %v5542_v30 = vld [vmem:[#allocation9_spill] sm:$0xff] }
 0x82b   :  { %v3705_v42 = vpop.f32.mrf.mxu1  ;;  %3771 = vmatpush3.msra.mxu0 %v4711_v49  ;;  %v5550_v40 = vld [vmem:[#allocation17_spill] sm:$0xff] }
 0x82c   :  { %v1414_v46 = vmul.f32 %v3705_v42, %v4490_v55  ;;  %3772 = vmatprep.subr.mxu0 %v4718_v50  ;;  %v1412_v55 = vmul.f32 %v3702_v36, %v4506_v61  ;;  %v1407_v61 = vmul.f32 %v1360_v33, %v4541_v7  ;;  %v1402_v7 = vmul.f32 %v4971_v26, %v4576_v17  ;;  %v5545_v33 = vld [vmem:[#allocation12_spill] sm:$0xff]  ;;  %v5551_v42 = vld [vmem:[#allocation18_spill] sm:$0xff] }
 0x82d   :  { %v1390_v47 = vpop.f32.mrf.mxu1  ;;  %3773 = vmatpush3.msra.mxu0 %v4718_v50  ;;  %v5549_v36 = vld [vmem:[#allocation16_spill] sm:$0xff] }
 0x82e   :  { %3707 = vmatpush3.xpose.msra.mxu1 %v1414_v46  ;;  %3774 = vmatprep.subr.mxu0 %v4725_v52  ;;  %v1413_v48 = vmul.f32 %v1390_v47, %v4498_v58  ;;  %v1410_v58 = vmul.f32 %v3699_v34, %v4520_v1  ;;  %v1405_v1 = vmul.f32 %v1350_v31, %v4555_v11  ;;  %v5543_v31 = vld [vmem:[#allocation10_spill] sm:$0xff]  ;;  %v5553_v47 = vld [vmem:[#allocation20_spill] sm:$0xff] }
 0x82f   :  { %3708 = vmatprep.subr.mxu1 %v5535_v54  ;;  %3775 = vmatpush3.msra.mxu0 %v4725_v52  ;;  %v1400_v11 = vmul.f32 %v4965_v23, %v4592_v39  ;;  %v5538_v39 = vld [vmem:[#allocation5_spill] sm:$0xff]  ;;  %v5539_v52 = vld [vmem:[#allocation6_spill] sm:$0xff] }
 0x830   :  { %3776 = vmatprep.subr.mxu0 %v4733_v53  ;;  %v5547_v34 = vld [vmem:[#allocation14_spill] sm:$0xff] }
 0x831   :  { %3777 = vmatpush3.msra.mxu0 %v4733_v53 }
 0x832   :  { %3709 = vmatpush3.xpose.msra.mxu1 %v1413_v48  ;;  %3781 = vmatprep.subr.mxu0 %v4470_v37  ;;  %v1408_v37 = vmul.f32 %v3696_v32, %v4534_v5  ;;  %v1403_v5 = vmul.f32 %v4983_v29, %v4569_v15  ;;  %v2994_v15 = vld [vmem:[%s5472_s3 + $0x1] sm:$0x1]  ;;  %v5541_v29 = vld [vmem:[#allocation8_spill] sm:$0xff] }
 0x833   :  { %3710 = vmatprep.subr.mxu1 %v5535_v54  ;;  %v5544_v32 = vld [vmem:[#allocation11_spill] sm:$0xff] }
 0x836   :  { %3711 = vmatpush3.xpose.msra.mxu1 %v1412_v55 }
 0x837   :  { %3712 = vmatprep.subr.mxu1 %v5535_v54 }
 0x83a   :  { %3713 = vmatpush3.xpose.msra.mxu1 %v1411_v14 }
 0x83b   :  { %3714 = vmatprep.subr.mxu1 %v5535_v54 }
 0x83e   :  { %3715 = vmatpush3.xpose.msra.mxu1 %v1410_v58 }
 0x83f   :  { %3716 = vmatprep.subr.mxu1 %v5535_v54 }
 0x842   :  { %3717 = vmatpush3.xpose.msra.mxu1 %v1409_v16 }
 0x843   :  { %3718 = vmatprep.subr.mxu1 %v5535_v54 }
 0x846   :  { %3719 = vmatpush3.xpose.msra.mxu1 %v1408_v37 }
 0x847   :  { %3720 = vmatprep.subr.mxu1 %v5535_v54 }
 0x84a   :  { %3721 = vmatpush3.xpose.msra.mxu1 %v1407_v61 }
 0x84b   :  { %3722 = vmatprep.subr.mxu1 %v5535_v54 }
 0x84e   :  { %3723 = vmatpush3.xpose.msra.mxu1 %v1406_v63 }
 0x84f   :  { %3724 = vmatprep.subr.mxu1 %v5535_v54 }
 0x852   :  { %3725 = vmatpush3.xpose.msra.mxu1 %v1405_v1 }
 0x853   :  { %3726 = vmatprep.subr.mxu1 %v5535_v54 }
 0x856   :  { %3727 = vmatpush3.xpose.msra.mxu1 %v1404_v3 }
 0x857   :  { %3728 = vmatprep.subr.mxu1 %v5535_v54 }
 0x85a   :  { %3729 = vmatpush3.xpose.msra.mxu1 %v1403_v5 }
 0x85b   :  { %3730 = vmatprep.subr.mxu1 %v5535_v54 }
 0x85e   :  { %3731 = vmatpush3.xpose.msra.mxu1 %v1402_v7 }
 0x85f   :  { %3732 = vmatprep.subr.mxu1 %v5535_v54 }
 0x862   :  { %3733 = vmatpush3.xpose.msra.mxu1 %v1401_v9 }
 0x863   :  { %3734 = vmatprep.subr.mxu1 %v5535_v54 }
 0x866   :  { %3735 = vmatpush3.xpose.msra.mxu1 %v1400_v11 }
 0x867   :  { %3736 = vmatprep.subr.mxu1 %v5535_v54 }
 0x86a   :  { %3737 = vmatpush3.xpose.msra.mxu1 %v1399_v13 }
 0x86b   :  { %3786 = vmatprep.subr.mxu1 %v1414_v46 }
 0x86d   :  { %3739 = vmatmul.mubr.f32.vlgmr.msra.gmra.mxu1 %v2994_v15 }
 0x86e   :  { %3787 = vmatpush3.msra.mxu1 %v1414_v46  ;;  %v5552_v46 = vld [vmem:[#allocation19_spill] sm:$0xff] }
 0x86f   :  { %3788 = vmatprep.subr.mxu1 %v1413_v48 }
 0x870   :  { %3789 = vmatpush3.msra.mxu1 %v1413_v48  ;;  %v5554_v48 = vld [vmem:[#allocation21_spill] sm:$0xff] }
 0x871   :  { %3790 = vmatprep.subr.mxu1 %v1412_v55 }
 0x872   :  { %3791 = vmatpush3.msra.mxu1 %v1412_v55  ;;  %v5555_v55 = vld [vmem:[#allocation22_spill] sm:$0xff] }
 0x873   :  { %3792 = vmatprep.subr.mxu1 %v1411_v14 }
 0x874   :  { %3793 = vmatpush3.msra.mxu1 %v1411_v14 }
 0x875   :  { %3794 = vmatprep.subr.mxu1 %v1410_v58 }
 0x876   :  { %3795 = vmatpush3.msra.mxu1 %v1410_v58 }
 0x877   :  { %3796 = vmatprep.subr.mxu1 %v1409_v16 }
 0x878   :  { %3797 = vmatpush3.msra.mxu1 %v1409_v16 }
 0x879   :  { %3798 = vmatprep.subr.mxu1 %v1408_v37 }
 0x87a   :  { %3799 = vmatpush3.msra.mxu1 %v1408_v37 }
 0x87b   :  { %3800 = vmatprep.subr.mxu1 %v1407_v61 }
 0x87c   :  { %3801 = vmatpush3.msra.mxu1 %v1407_v61 }
 0x87d   :  { %3802 = vmatprep.subr.mxu1 %v1406_v63 }
 0x87e   :  { %3803 = vmatpush3.msra.mxu1 %v1406_v63 }
 0x87f   :  { %3804 = vmatprep.subr.mxu1 %v1405_v1 }
 0x880   :  { %3805 = vmatpush3.msra.mxu1 %v1405_v1  ;;  %v3006_v1 = vld [vmem:[%s5470_s1 + $0x28] sm:$0xff] }
 0x881   :  { %3806 = vmatprep.subr.mxu1 %v1404_v3 }
 0x882   :  { %3807 = vmatpush3.msra.mxu1 %v1404_v3  ;;  %v3005_v3 = vld [vmem:[%s5470_s1 + $0x20] sm:$0xff] }
 0x883   :  { %3808 = vmatprep.subr.mxu1 %v1403_v5 }
 0x884   :  { %3809 = vmatpush3.msra.mxu1 %v1403_v5  ;;  %v3000_v5 = vld [vmem:[%s5473_s4 + $0x1] ss:$0 sm:$0xff] }
 0x885   :  { %3810 = vmatprep.subr.mxu1 %v1402_v7 }
 0x886   :  { %3811 = vmatpush3.msra.mxu1 %v1402_v7 }
 0x887   :  { %3812 = vmatprep.subr.mxu1 %v1401_v9 }
 0x888   :  { %3813 = vmatpush3.msra.mxu1 %v1401_v9 }
 0x889   :  { %3814 = vmatprep.subr.mxu1 %v1400_v11 }
 0x88a   :  { %3815 = vmatpush3.msra.mxu1 %v1400_v11 }
 0x88b   :  { %3816 = vmatprep.subr.mxu1 %v1399_v13 }
 0x88c   :  { %3817 = vmatpush3.msra.mxu1 %v1399_v13 }
 0x88d   :  { %3856 = vmatprep.subr.mxu1 %v5535_v54 }
 0x8d2   :  { %v3745_v17 = vpop.f32.mrf.mxu0 }
 0x8d4   :  { %v1563_v18 = vpop.f32.mrf.mxu0 }
 0x92d   :  { %v1483_v20 = vpop.f32.mrf.mxu1 }
 0x92e   :  { %v1490_v43 = vrot.slane %v1483_v20, %v5538_v39 }
 0x92f   :  { %v3740_v21 = vpop.f32.mrf.mxu1 }
 0x930   :  { %v1564_v41 = vadd.f32 %v1563_v18, %v1490_v43  ;;  %v1569_v44 = vadd.f32 %v3745_v17, %v1490_v43 }
 0x932   :  { %vm1572_vm8 = vcmp.gt.f32.partialorder %v1564_v41, 0.0  ;;  %v1574_v45 = vmul.f32 0.2, %v1564_v41  ;;  %v1575_v49 = vmul.f32 0.2, %v1569_v44  ;;  %vm1573_vm9 = vcmp.gt.f32.partialorder %v1569_v44, 0.0 }
 0x934   :  { %v1576_v50 = vsel %vm1572_vm8, %v1564_v41, %v1574_v45  ;;  %v1577_v10 = vsel %vm1573_vm9, %v1569_v44, %v1575_v49  ;;  %v3024_v44 = vld [vmem:[%s5471_s2 + $0x178] sm:$0xff]  ;;  %v3023_v49 = vld [vmem:[%s5471_s2 + $0x170] sm:$0xff] }
 0x935   :  { %v1578_v53 = vadd.f32 %v1576_v50, %v5539_v52  ;;  %v1579_v4 = vadd.f32 %v1577_v10, %v5540_v56  ;;  %v4132_v50 = vld [vmem:[%s5476_s7] sm:$0xff]  ;;  %v3022_v52 = vld [vmem:[%s5471_s2 + $0x168] sm:$0xff]  ;;  %v3019_v10 = vld [vmem:[%s5471_s2 + $0x150] sm:$0xff] }
 0x936   :  { %v3018_v56 = vld [vmem:[%s5471_s2 + $0x148] sm:$0xff] }
 0x937   :  { %1580 = vmax.xlane.f32.xlu1 %v1578_v53 }
 0x93b   :  { %1582 = vmax.xlane.f32.xlu1 %v1579_v4 }
 0x9c0   :  { %v1581_v2 = vpop.xlane.xlu1 %1580 }
 0x9c1   :  { %v1584_v59 = vsub.f32 %v1578_v53, %v1581_v2  ;;  %v3021_v53 = vld [vmem:[%s5471_s2 + $0x160] sm:$0xff]  ;;  %v3016_v2 = vld [vmem:[%s5471_s2 + $0x138] sm:$0xff] }
 0x9c3   :  { %v1586_v60 = vmul.f32 1.442695, %v1584_v59  ;;  %v3015_v59 = vld [vmem:[%s5471_s2 + $0x130] sm:$0xff] }
 0x9c4   :  { %v1583_v6 = vpop.xlane.xlu1 %1582 }
 0x9c5   :  { %4107 = vpow2.f32 %v1586_v60  ;;  %v1585_v51 = vsub.f32 %v1579_v4, %v1583_v6  ;;  %v3017_v4 = vld [vmem:[%s5471_s2 + $0x140] sm:$0xff]  ;;  %v3014_v60 = vld [vmem:[%s5471_s2 + $0x128] sm:$0xff] }
 0x9c6   :  { %v3013_v6 = vld [vmem:[%s5471_s2 + $0x120] sm:$0xff] }
 0x9c7   :  { %v1588_v57 = vmul.f32 1.442695, %v1585_v51  ;;  %v3012_v51 = vld [vmem:[%s5471_s2 + $0x118] sm:$0xff] }
 0x9c9   :  { %4109 = vpow2.f32 %v1588_v57  ;;  %v3011_v57 = vld [vmem:[%s5471_s2 + $0x110] sm:$0xff] }
 0x9d2   :  { %v4108_v38 = vpop.eup %4107 }
 0x9d3   :  { %3778 = vmatprep.mubr.f32.mxu0 %v4108_v38 }
 0x9d6   :  { %v4110_v62 = vpop.eup %4109 }
 0x9d7   :  { %3779 = vmatmul.mubr.f32.vlgmr.msra.gmra.mxu0 %v4110_v62 }
 0x9d8   :  { %3782 = vmatpush3.msra.mxu0 %v5058_v19 }
 0x9d9   :  { %3821 = vmatprep.subr.mxu0 %v4745_v12 }
 0xa97   :  { %v3780_v8 = vpop.f32.mrf.mxu0 }
 0xa98   :  { %v1666_v22 = vmax.f32 %v3780_v8, 1e-30 }
 0xa99   :  { %v1656_v23 = vpop.f32.mrf.mxu0 }
 0xa9a   :  { %v1665_v24 = vmax.f32 %v1656_v23, 1e-30  ;;  %4111 = vrcp.f32 %v1666_v22 }
 0xa9c   :  { %4113 = vrcp.f32 %v1665_v24 }
 0xaa7   :  { %v4112_v25 = vpop.eup %4111 }
 0xaa8   :  { %v1670_v28 = vmul.f32 0.125, %v4112_v25  ;;  %v4133_v25 = vld [vmem:[%s5476_s7 + $0x8] sm:$0xff] }
 0xaa9   :  { %v4114_v26 = vpop.eup %4113 }
 0xaaa   :  { %v1669_v27 = vmul.f32 0.125, %v4114_v26  ;;  %v4134_v26 = vld [vmem:[%s5476_s7 + $0x10] sm:$0xff] }
 0xaac   :  { %3783 = vmatprep.mubr.msk.f32.mxu0 %vm115_vm0, %v1669_v27  ;;  %v4135_v27 = vld [vmem:[%s5479_s10 + $0x78] sm:$0xff] }
 0xaad   :  { %3784 = vmatmul.mubr.msk.f32.vlgmr.msra.gmra.mxu0 %vm115_vm0, %v1670_v28  ;;  %v4136_v28 = vld [vmem:[%s5476_s7 + $0x18] sm:$0xff] }
 0xaae   :  { %3822 = vmatpush3.msra.mxu0 %v4745_v12  ;;  %v5546_v12 = vld [vmem:[#allocation13_spill] sm:$0xff] }
 0xaaf   :  { %3823 = vmatprep.subr.mxu0 %v5541_v29 }
 0xab0   :  { %3824 = vmatpush3.msra.mxu0 %v5541_v29  ;;  %v4137_v29 = vld [vmem:[%s5476_s7 + $0x20] sm:$0xff] }
 0xab1   :  { %3825 = vmatprep.subr.mxu0 %v5542_v30 }
 0xab2   :  { %3826 = vmatpush3.msra.mxu0 %v5542_v30  ;;  %v4138_v30 = vld [vmem:[%s5476_s7 + $0x28] sm:$0xff] }
 0xab3   :  { %3827 = vmatprep.subr.mxu0 %v5543_v31 }
 0xab4   :  { %3828 = vmatpush3.msra.mxu0 %v5543_v31  ;;  %v4139_v31 = vld [vmem:[%s5476_s7 + $0x30] sm:$0xff] }
 0xab5   :  { %3829 = vmatprep.subr.mxu0 %v5544_v32 }
 0xab6   :  { %3830 = vmatpush3.msra.mxu0 %v5544_v32  ;;  %v4140_v32 = vld [vmem:[%s5476_s7 + $0x38] sm:$0xff] }
 0xab7   :  { %3831 = vmatprep.subr.mxu0 %v5545_v33 }
 0xab8   :  { %3832 = vmatpush3.msra.mxu0 %v5545_v33  ;;  %v4141_v33 = vld [vmem:[%s5476_s7 + $0x40] sm:$0xff] }
 0xab9   :  { %3833 = vmatprep.subr.mxu0 %v5546_v12 }
 0xaba   :  { %3834 = vmatpush3.msra.mxu0 %v5546_v12  ;;  %v4142_v12 = vld [vmem:[%s5476_s7 + $0x48] sm:$0xff] }
 0xabb   :  { %3835 = vmatprep.subr.mxu0 %v5547_v34 }
 0xabc   :  { %3836 = vmatpush3.msra.mxu0 %v5547_v34  ;;  %v4143_v34 = vld [vmem:[%s5476_s7 + $0x50] sm:$0xff] }
 0xabd   :  { %3837 = vmatprep.subr.mxu0 %v5548_v35 }
 0xabe   :  { %3838 = vmatpush3.msra.mxu0 %v5548_v35  ;;  %v4144_v35 = vld [vmem:[%s5476_s7 + $0x58] sm:$0xff] }
 0xabf   :  { %3839 = vmatprep.subr.mxu0 %v5549_v36 }
 0xac0   :  { %3840 = vmatpush3.msra.mxu0 %v5549_v36  ;;  %v4145_v36 = vld [vmem:[%s5476_s7 + $0x60] sm:$0xff] }
 0xac1   :  { %3841 = vmatprep.subr.mxu0 %v5550_v40 }
 0xac2   :  { %3842 = vmatpush3.msra.mxu0 %v5550_v40  ;;  %v4146_v40 = vld [vmem:[%s5476_s7 + $0x68] sm:$0xff] }
 0xac3   :  { %3843 = vmatprep.subr.mxu0 %v5551_v42 }
 0xac4   :  { %3844 = vmatpush3.msra.mxu0 %v5551_v42  ;;  %v4147_v42 = vld [vmem:[%s5476_s7 + $0x70] sm:$0xff] }
 0xac5   :  { %3845 = vmatprep.subr.mxu0 %v5552_v46 }
 0xac6   :  { %3846 = vmatpush3.msra.mxu0 %v5552_v46  ;;  %v4148_v46 = vld [vmem:[%s5476_s7 + $0x78] sm:$0xff] }
 0xac7   :  { %3847 = vmatprep.subr.mxu0 %v5553_v47 }
 0xac8   :  { %3848 = vmatpush3.msra.mxu0 %v5553_v47 }
 0xac9   :  { %3849 = vmatprep.subr.mxu0 %v5554_v48 }
 0xaca   :  { %3850 = vmatpush3.msra.mxu0 %v5554_v48 }
 0xacb   :  { %3851 = vmatprep.subr.mxu0 %v5555_v55 }
 0xacc   :  { %3852 = vmatpush3.msra.mxu0 %v5555_v55 }
 0xacd   :  { %3863 = vmatprep.subr.mxu0 %v3006_v1 }
 0xb6d   :  { %v3785_v14 = vpop.f32.mrf.mxu0 }
 0xb6e   :  { %v1753_v37 = vmul.f32 %v4110_v62, %v3785_v14  ;;  %v3009_v62 = vld [vmem:[%s5471_s2 + $0x100] sm:$0xff] }
 0xb6f   :  { %v1743_v58 = vpop.f32.mrf.mxu0 }
 0xb70   :  { %v1752_v16 = vmul.f32 %v4108_v38, %v1743_v58  ;;  %v3010_v38 = vld [vmem:[%s5471_s2 + $0x108] sm:$0xff] }
 0xb72   :  { %3818 = vmatprep.mubr.f32.mxu1 %v1752_v16  ;;  %v4149_v16 = vld [vmem:[%s5479_s10 + $0x70] sm:$0xff] }
 0xb73   :  { %3819 = vmatmul.mubr.f32.vlgmr.msra.gmra.mxu1 %v1753_v37 }
 0xb74   :  { %3860 = vmatprep.mubr.msk.f32.mxu1 %vm4222_vm2, %v5535_v54 }
 0xc33   :  { %v3820_v61 = vpop.f32.mrf.mxu1 }
 0xc35   :  { %v1820_v63 = vpop.f32.mrf.mxu1 }
 0xc36   :  { %3853 = vmatprep.mubr.f32.mxu0 %v1820_v63 }
 0xc37   :  { %3854 = vmatmul.mubr.f32.vlgmr.msra.gmra.mxu0 %v3820_v61  ;;  %v4150_v61 = vld [vmem:[%s5479_s10 + $0x68] sm:$0xff] }
 0xc38   :  { %3864 = vmatpush3.msra.mxu0 %v3006_v1  ;;  %v4151_v1 = vld [vmem:[%s5479_s10 + $0x60] sm:$0xff] }
 0xc39   :  { %3865 = vmatprep.subr.mxu0 %v3005_v3 }
 0xc3a   :  { %3866 = vmatpush3.msra.mxu0 %v3005_v3 }
 0xcf7   :  { %v3855_v7 = vpop.f32.mrf.mxu0 }
 0xcf8   :  { %v1909_v9 = vadd.f32 %v3855_v7, %v3000_v5 }
 0xcf9   :  { %v1903_v11 = vpop.f32.mrf.mxu0 }
 0xcfa   :  { %v1916_v13 = vmul.f32 1.442695, %v1909_v9  ;;  %v1904_v15 = vadd.f32 %v3000_v5, %v1903_v11  ;;  %vm1913_vm10 = vcmp.gt.f32.partialorder %v1909_v9, 0.0  ;;  %v4152_v5 = vld [vmem:[%s5479_s10 + $0x58] sm:$0xff] }
 0xcfc   :  { %4115 = vpow2.f32 %v1916_v13  ;;  %v1914_v17 = vmul.f32 1.442695, %v1904_v15  ;;  %vm1912_vm11 = vcmp.gt.f32.partialorder %v1904_v15, 0.0  ;;  %v4154_v13 = vld [vmem:[%s5479_s10 + $0x48] sm:$0xff] }
 0xcfe   :  { %4117 = vpow2.f32 %v1914_v17  ;;  %v4155_v17 = vld [vmem:[%s5479_s10 + $0x40] sm:$0xff] }
 0xd09   :  { %v4116_v20 = vpop.eup %4115 }
 0xd0a   :  { %v3002_v43 = vadd.f32 -1.0, %v4116_v20 }
 0xd0b   :  { %v4118_v18 = vpop.eup %4117 }
 0xd0c   :  { %v1921_v21 = vsel %vm1913_vm10, %v1909_v9, %v3002_v43  ;;  %v3001_v41 = vadd.f32 -1.0, %v4118_v18  ;;  %v4153_v9 = vld [vmem:[%s5479_s10 + $0x50] sm:$0xff]  ;;  %v4156_v43 = vld [vmem:[%s5479_s10 + $0x38] sm:$0xff] }
 0xd0d   :  { %3857 = vmatpush3.msra.mxu1 %v1921_v21 }
 0xd0e   :  { %3858 = vmatprep.subr.mxu1 %v5535_v54  ;;  %v1920_v45 = vsel %vm1912_vm11, %v1904_v15, %v3001_v41 }
 0xd0f   :  { %3859 = vmatpush3.msra.mxu1 %v1920_v45  ;;  %3867 = vmatprep.mubr.msk.f32.mxu0 %vm288_vm1, %v1920_v45 }
 0xd10   :  { %3868 = vmatmul.mubr.msk.f32.vlgmr.msra.gmra.mxu0 %vm288_vm1, %v1921_v21  ;;  %3870 = vmatprep.subr.mxu1 %v3024_v44  ;;  %v4157_v21 = vld [vmem:[%s5479_s10 + $0x30] sm:$0xff] }
 0xd11   :  { %3861 = vmatmul.mubr.msk.f32.vlgmr.msra.gmra.mxu1 %vm288_vm1, %v4872_v0  ;;  %3909 = vmatprep.mubr.msk.f32.mxu0 %vm288_vm1, %v4132_v50  ;;  %v3020_v0 = vld [vmem:[%s5471_s2 + $0x158] sm:$0xff] }
 0xd12   :  { %3871 = vmatpush3.msra.mxu1 %v3024_v44  ;;  %v4158_v44 = vld [vmem:[%s5479_s10 + $0x28] sm:$0xff] }
 0xd13   :  { %3872 = vmatprep.subr.mxu1 %v3023_v49 }
 0xd14   :  { %3873 = vmatpush3.msra.mxu1 %v3023_v49  ;;  %v4159_v49 = vld [vmem:[%s5479_s10 + $0x20] sm:$0xff] }
 0xd15   :  { %3874 = vmatprep.subr.mxu1 %v3022_v52 }
 0xd16   :  { %3875 = vmatpush3.msra.mxu1 %v3022_v52  ;;  %v4160_v52 = vld [vmem:[%s5479_s10 + $0x18] sm:$0xff] }
 0xd17   :  { %3876 = vmatprep.subr.mxu1 %v3021_v53 }
 0xd18   :  { %3877 = vmatpush3.msra.mxu1 %v3021_v53 }
 0xd19   :  { %3878 = vmatprep.subr.mxu1 %v3020_v0 }
 0xd1a   :  { %3879 = vmatpush3.msra.mxu1 %v3020_v0  ;;  %v4161_v0 = vld [vmem:[%s5477_s8 + $0x78] sm:$0xff] }
 0xd1b   :  { %3880 = vmatprep.subr.mxu1 %v3019_v10 }
 0xd1c   :  { %3881 = vmatpush3.msra.mxu1 %v3019_v10 }
 0xd1d   :  { %3882 = vmatprep.subr.mxu1 %v3018_v56 }
 0xd1e   :  { %3883 = vmatpush3.msra.mxu1 %v3018_v56  ;;  %v4162_v56 = vld [vmem:[%s5479_s10 + $0x10] sm:$0xff] }
 0xd1f   :  { %3884 = vmatprep.subr.mxu1 %v3017_v4 }
 0xd20   :  { %3885 = vmatpush3.msra.mxu1 %v3017_v4 }
 0xd21   :  { %3886 = vmatprep.subr.mxu1 %v3016_v2 }
 0xd22   :  { %3887 = vmatpush3.msra.mxu1 %v3016_v2  ;;  %v4163_v2 = vld [vmem:[%s5479_s10 + $0x8] sm:$0xff] }
 0xd23   :  { %3888 = vmatprep.subr.mxu1 %v3015_v59 }
 0xd24   :  { %3889 = vmatpush3.msra.mxu1 %v3015_v59  ;;  %v4164_v59 = vld [vmem:[%s5477_s8 + $0x70] sm:$0xff] }
 0xd25   :  { %3890 = vmatprep.subr.mxu1 %v3014_v60 }
 0xd26   :  { %3891 = vmatpush3.msra.mxu1 %v3014_v60 }
 0xd27   :  { %3892 = vmatprep.subr.mxu1 %v3013_v6 }
 0xd28   :  { %3893 = vmatpush3.msra.mxu1 %v3013_v6  ;;  %v4165_v6 = vld [vmem:[%s5479_s10] sm:$0xff] }
 0xd29   :  { %3894 = vmatprep.subr.mxu1 %v3012_v51 }
 0xd2a   :  { %3895 = vmatpush3.msra.mxu1 %v3012_v51  ;;  %v4166_v51 = vld [vmem:[%s5477_s8 + $0x68] sm:$0xff] }
 0xd2b   :  { %3896 = vmatprep.subr.mxu1 %v3011_v57 }
 0xd2c   :  { %3897 = vmatpush3.msra.mxu1 %v3011_v57 }
 0xd2d   :  { %3898 = vmatprep.subr.mxu1 %v3010_v38 }
 0xd2e   :  { %3899 = vmatpush3.msra.mxu1 %v3010_v38  ;;  %v4167_v38 = vld [vmem:[%s5477_s8 + $0x60] sm:$0xff] }
 0xd2f   :  { %3900 = vmatprep.subr.mxu1 %v3009_v62 }
 0xd30   :  { %3901 = vmatpush3.msra.mxu1 %v3009_v62 }
 0xd31   :  { %3968 = vmatprep.subr.mxu1 %v5058_v19 }
 0xdd0   :  { %v3869_v8 = vpop.f32.mrf.mxu0 }
 0xdd1   :  { %3905 = vmatprep.subr.mxu0 %v3869_v8  ;;  %v1988_v22 = vpop.f32.mrf.mxu1 }
 0xdd2   :  { %v2069_v23 = vpop.f32.mrf.mxu0  ;;  %3906 = vmatpush3.msra.mxu0 %v3869_v8  ;;  %3004 = vst.msk [vmem:[%s5481_s12 + $0x2] sm:$0x3] %vm1076_vm7, %v1988_v22 }
 0xdd3   :  { %3902 = vmatprep.mubr.f32.mxu1 %v2069_v23  ;;  %3907 = vmatprep.subr.mxu0 %v2069_v23  ;;  %v3862_v24 = vpop.f32.mrf.mxu1 }
 0xdd4   :  { %3903 = vmatmul.mubr.f32.vlgmr.msra.gmra.mxu1 %v3869_v8  ;;  %3908 = vmatpush3.msra.mxu0 %v2069_v23  ;;  %v4168_v8 = vld [vmem:[%s5477_s8 + $0x58] sm:$0xff]  ;;  %v4169_v23 = vld [vmem:[%s5477_s8 + $0x50] sm:$0xff] }
 0xdd5   :  { %3910 = vmatmul.mubr.msk.f32.vlgmr.msra.gmra.mxu0 %vm288_vm1, %v4133_v25  ;;  %3969 = vmatpush3.msra.mxu1 %v5058_v19  ;;  %v4170_v25 = vld [vmem:[%s5477_s8 + $0x48] sm:$0xff] }
 0xdd6   :  { %3912 = vmatprep.mubr.msk.f32.mxu0 %vm288_vm1, %v4134_v26  ;;  %3933 = vmatprep.subr.mxu0 %v5535_v54 }
 0xdd7   :  { %3973 = vmatprep.subr.mxu1 %v4135_v27 }
 0xdd9   :  { %3913 = vmatmul.mubr.msk.f32.gmra.mxu0 %vm288_vm1, %v4136_v28 }
 0xdda   :  { %3915 = vmatprep.mubr.msk.f32.mxu0 %vm288_vm1, %v4137_v29  ;;  %v4172_v29 = vld [vmem:[%s5477_s8 + $0x38] sm:$0xff] }
 0xddd   :  { %3916 = vmatmul.mubr.msk.f32.gmra.mxu0 %vm288_vm1, %v4138_v30 }
 0xdde   :  { %3918 = vmatprep.mubr.msk.f32.mxu0 %vm288_vm1, %v4139_v31  ;;  %v4173_v31 = vld [vmem:[%s5477_s8 + $0x30] sm:$0xff] }
 0xde1   :  { %3919 = vmatmul.mubr.msk.f32.gmra.mxu0 %vm288_vm1, %v4140_v32 }
 0xde2   :  { %3921 = vmatprep.mubr.msk.f32.mxu0 %vm288_vm1, %v4141_v33  ;;  %v4174_v33 = vld [vmem:[%s5477_s8 + $0x28] sm:$0xff] }
 0xde5   :  { %3922 = vmatmul.mubr.msk.f32.gmra.mxu0 %vm288_vm1, %v4142_v12 }
 0xde6   :  { %3924 = vmatprep.mubr.msk.f32.mxu0 %vm288_vm1, %v4143_v34  ;;  %v4175_v34 = vld [vmem:[%s5477_s8 + $0x20] sm:$0xff] }
 0xde9   :  { %3925 = vmatmul.mubr.msk.f32.gmra.mxu0 %vm288_vm1, %v4144_v35 }
 0xdea   :  { %3927 = vmatprep.mubr.msk.f32.mxu0 %vm288_vm1, %v4145_v36  ;;  %v4176_v36 = vld [vmem:[%s5477_s8 + $0x18] sm:$0xff] }
 0xded   :  { %3928 = vmatmul.mubr.msk.f32.gmra.mxu0 %vm288_vm1, %v4146_v40 }
 0xdee   :  { %3930 = vmatprep.mubr.msk.f32.mxu0 %vm288_vm1, %v4147_v42  ;;  %v4177_v42 = vld [vmem:[%s5477_s8 + $0x10] sm:$0xff] }
 0xdf1   :  { %3931 = vmatmul.mubr.msk.f32.gmra.mxu0 %vm288_vm1, %v4148_v46 }
 0xdf2   :  { %3965 = vmatprep.mubr.msk.f32.mxu0 %vm4222_vm2, %v5535_v54 }
 0xe94   :  { %v3904_v47 = vpop.f32.mrf.mxu1 }
 0xe95   :  { %v5235_v48 = vpop.f32.mrf.mxu0 }
 0xe96   :  { %v2161_v55 = vpop.f32.mrf.mxu1 }
 0xe97   :  { %v5237_v14 = vpop.f32.mrf.mxu0  ;;  %3970 = vmatprep.mubr.msk.f32.mxu1 %vm115_vm0, %v2161_v55 }
 0xe98   :  { %3971 = vmatmul.mubr.msk.f32.vlgmr.msra.gmra.mxu1 %vm115_vm0, %v3904_v47  ;;  %v4178_v47 = vld [vmem:[%s5477_s8 + $0x8] sm:$0xff] }
 0xe99   :  { %v5241_v58 = vpop.f32.mrf.mxu0  ;;  %3974 = vmatpush3.msra.mxu1 %v4135_v27  ;;  %v4171_v27 = vld [vmem:[%s5477_s8 + $0x40] sm:$0xff]  ;;  %v2316_v55 = vmul.f32 %v4178_v47, %v5235_v48 }
 0xe9a   :  { %3975 = vmatprep.subr.mxu1 %v4149_v16  ;;  %v2318_v40 = vmul.f32 %v4176_v36, %v5241_v58  ;;  %v4179_v58 = vld [vmem:[%s5477_s8] sm:$0xff] }
 0xe9b   :  { %v5246_v37 = vpop.f32.mrf.mxu0  ;;  %3976 = vmatpush3.msra.mxu1 %v4149_v16  ;;  %v2315_v16 = vmul.f32 %v4179_v58, %v5237_v14 }
 0xe9c   :  { %3977 = vmatprep.subr.mxu1 %v4150_v61  ;;  %v2317_v46 = vmul.f32 %v4177_v42, %v5246_v37  ;;  %v3041_v37 = vld [vmem:[%s5472_s3 + $0x2] sm:$0x1] }
 0xe9d   :  { %v5251_v63 = vpop.f32.mrf.mxu0  ;;  %3978 = vmatpush3.msra.mxu1 %v4150_v61 }
 0xe9e   :  { %3979 = vmatprep.subr.mxu1 %v4151_v1  ;;  %v2320_v12 = vmul.f32 %v4174_v33, %v5251_v63 }
 0xe9f   :  { %v5256_v3 = vpop.f32.mrf.mxu0  ;;  %3980 = vmatpush3.msra.mxu1 %v4151_v1 }
 0xea0   :  { %3981 = vmatprep.subr.mxu1 %v4152_v5  ;;  %v2319_v35 = vmul.f32 %v4175_v34, %v5256_v3 }
 0xea1   :  { %v5261_v7 = vpop.f32.mrf.mxu0  ;;  %3982 = vmatpush3.msra.mxu1 %v4152_v5 }
 0xea2   :  { %3983 = vmatprep.subr.mxu1 %v4153_v9  ;;  %v2322_v30 = vmul.f32 %v4172_v29, %v5261_v7  ;;  %v4197_v29 = vld [vmem:[%s5480_s11] sm:$0xff] }
 0xea3   :  { %v5266_v11 = vpop.f32.mrf.mxu0  ;;  %3984 = vmatpush3.msra.mxu1 %v4153_v9 }
 0xea4   :  { %3985 = vmatprep.subr.mxu1 %v4154_v13  ;;  %v2321_v32 = vmul.f32 %v4173_v31, %v5266_v11 }
 0xea5   :  { %v3923_v15 = vpop.f32.mrf.mxu0  ;;  %3986 = vmatpush3.msra.mxu1 %v4154_v13 }
 0xea6   :  { %3987 = vmatprep.subr.mxu1 %v4155_v17  ;;  %v2324_v26 = vmul.f32 %v4170_v25, %v3923_v15  ;;  %v4180_v15 = vld [vmem:[%s5474_s5 + $0x8] sm:$0xff]  ;;  %v4193_v25 = vld [vmem:[%s5480_s11 + $0x20] sm:$0xff] }
 0xea7   :  { %v2276_v20 = vpop.f32.mrf.mxu0  ;;  %3988 = vmatpush3.msra.mxu1 %v4155_v17 }
 0xea8   :  { %3989 = vmatprep.subr.mxu1 %v4156_v43  ;;  %v2323_v28 = vmul.f32 %v4171_v27, %v2276_v20  ;;  %v4181_v20 = vld [vmem:[%s5474_s5] sm:$0xff]  ;;  %v4195_v27 = vld [vmem:[%s5480_s11 + $0x10] sm:$0xff] }
 0xea9   :  { %v3926_v18 = vpop.f32.mrf.mxu0  ;;  %3990 = vmatpush3.msra.mxu1 %v4156_v43 }
 0xeaa   :  { %3991 = vmatprep.subr.mxu1 %v4157_v21  ;;  %v2326_v22 = vmul.f32 %v4168_v8, %v3926_v18  ;;  %v4189_v8 = vld [vmem:[%s5480_s11 + $0x40] sm:$0xff] }
 0xeab   :  { %v2286_v41 = vpop.f32.mrf.mxu0  ;;  %3992 = vmatpush3.msra.mxu1 %v4157_v21 }
 0xeac   :  { %3993 = vmatprep.subr.mxu1 %v4158_v44  ;;  %v2325_v24 = vmul.f32 %v4169_v23, %v2286_v41  ;;  %v4191_v23 = vld [vmem:[%s5480_s11 + $0x30] sm:$0xff] }
 0xead   :  { %v3929_v45 = vpop.f32.mrf.mxu0  ;;  %3994 = vmatpush3.msra.mxu1 %v4158_v44 }
 0xeae   :  { %3995 = vmatprep.subr.mxu1 %v4159_v49  ;;  %v2328_v57 = vmul.f32 %v4166_v51, %v3929_v45  ;;  %v4185_v51 = vld [vmem:[%s5480_s11 + $0x60] sm:$0xff] }
 0xeaf   :  { %v2296_v50 = vpop.f32.mrf.mxu0  ;;  %3996 = vmatpush3.msra.mxu1 %v4159_v49 }
 0xeb0   :  { %3997 = vmatprep.subr.mxu1 %v4160_v52  ;;  %v2327_v62 = vmul.f32 %v4167_v38, %v2296_v50  ;;  %v4187_v38 = vld [vmem:[%s5480_s11 + $0x50] sm:$0xff] }
 0xeb1   :  { %v3932_v53 = vpop.f32.mrf.mxu0  ;;  %3998 = vmatpush3.msra.mxu1 %v4160_v52  ;;  %v4182_v52 = vld [vmem:[%s5480_s11 + $0x78] sm:$0xff] }
 0xeb2   :  { %v5292_v10 = vmul.f32 %v4161_v0, %v3932_v53  ;;  %3999 = vmatprep.subr.mxu1 %v4162_v56 }
 0xeb3   :  { %v2306_v4 = vpop.f32.mrf.mxu0  ;;  %4000 = vmatpush3.msra.mxu1 %v4162_v56 }
 0xeb4   :  { %3934 = vmatpush3.xpose.msra.mxu0 %v5292_v10  ;;  %4001 = vmatprep.subr.mxu1 %v4163_v2  ;;  %v5305_v60 = vmul.f32 %v4164_v59, %v2306_v4 }
 0xeb5   :  { %3935 = vmatprep.subr.mxu0 %v5535_v54  ;;  %4002 = vmatpush3.msra.mxu1 %v4163_v2 }
 0xeb6   :  { %4003 = vmatprep.subr.mxu1 %v4165_v6 }
 0xeb7   :  { %4004 = vmatpush3.msra.mxu1 %v4165_v6  ;;  %v4184_v6 = vld [vmem:[%s5480_s11 + $0x68] sm:$0xff] }
 0xeb8   :  { %3936 = vmatpush3.xpose.msra.mxu0 %v5305_v60  ;;  %4008 = vmatprep.subr.mxu1 %v5058_v19 }
 0xeb9   :  { %3937 = vmatprep.subr.mxu0 %v5535_v54 }
 0xebc   :  { %3938 = vmatpush3.xpose.msra.mxu0 %v2328_v57 }
 0xebd   :  { %3939 = vmatprep.subr.mxu0 %v5535_v54 }
 0xec0   :  { %3940 = vmatpush3.xpose.msra.mxu0 %v2327_v62 }
 0xec1   :  { %3941 = vmatprep.subr.mxu0 %v5535_v54 }
 0xec4   :  { %3942 = vmatpush3.xpose.msra.mxu0 %v2326_v22 }
 0xec5   :  { %3943 = vmatprep.subr.mxu0 %v5535_v54 }
 0xec8   :  { %3944 = vmatpush3.xpose.msra.mxu0 %v2325_v24 }
 0xec9   :  { %3945 = vmatprep.subr.mxu0 %v5535_v54 }
 0xecc   :  { %3946 = vmatpush3.xpose.msra.mxu0 %v2324_v26 }
 0xecd   :  { %3947 = vmatprep.subr.mxu0 %v5535_v54 }
 0xed0   :  { %3948 = vmatpush3.xpose.msra.mxu0 %v2323_v28 }
 0xed1   :  { %3949 = vmatprep.subr.mxu0 %v5535_v54 }
 0xed4   :  { %3950 = vmatpush3.xpose.msra.mxu0 %v2322_v30 }
 0xed5   :  { %3951 = vmatprep.subr.mxu0 %v5535_v54 }
 0xed8   :  { %3952 = vmatpush3.xpose.msra.mxu0 %v2321_v32 }
 0xed9   :  { %3953 = vmatprep.subr.mxu0 %v5535_v54 }
 0xedc   :  { %3954 = vmatpush3.xpose.msra.mxu0 %v2320_v12 }
 0xedd   :  { %3955 = vmatprep.subr.mxu0 %v5535_v54 }
 0xee0   :  { %3956 = vmatpush3.xpose.msra.mxu0 %v2319_v35 }
 0xee1   :  { %3957 = vmatprep.subr.mxu0 %v5535_v54 }
 0xee4   :  { %3958 = vmatpush3.xpose.msra.mxu0 %v2318_v40 }
 0xee5   :  { %3959 = vmatprep.subr.mxu0 %v5535_v54 }
 0xee8   :  { %3960 = vmatpush3.xpose.msra.mxu0 %v2317_v46 }
 0xee9   :  { %3961 = vmatprep.subr.mxu0 %v5535_v54 }
 0xeec   :  { %3962 = vmatpush3.xpose.msra.mxu0 %v2316_v55 }
 0xeed   :  { %3963 = vmatprep.subr.mxu0 %v5535_v54 }
 0xef0   :  { %3964 = vmatpush3.xpose.msra.mxu0 %v2315_v16 }
 0xef1   :  { %4013 = vmatprep.subr.mxu0 %v5292_v10 }
 0xef3   :  { %3966 = vmatmul.mubr.f32.vlgmr.msra.gmra.mxu0 %v3041_v37 }
 0xef4   :  { %4014 = vmatpush3.msra.mxu0 %v5292_v10 }
 0xef5   :  { %4015 = vmatprep.subr.mxu0 %v5305_v60 }
 0xef6   :  { %4016 = vmatpush3.msra.mxu0 %v5305_v60 }
 0xef7   :  { %4017 = vmatprep.subr.mxu0 %v2328_v57 }
 0xef8   :  { %4018 = vmatpush3.msra.mxu0 %v2328_v57  ;;  %v4186_v57 = vld [vmem:[%s5480_s11 + $0x58] sm:$0xff] }
 0xef9   :  { %4019 = vmatprep.subr.mxu0 %v2327_v62 }
 0xefa   :  { %4020 = vmatpush3.msra.mxu0 %v2327_v62  ;;  %v4188_v62 = vld [vmem:[%s5480_s11 + $0x48] sm:$0xff] }
 0xefb   :  { %4021 = vmatprep.subr.mxu0 %v2326_v22 }
 0xefc   :  { %4022 = vmatpush3.msra.mxu0 %v2326_v22  ;;  %v4190_v22 = vld [vmem:[%s5480_s11 + $0x38] sm:$0xff] }
 0xefd   :  { %4023 = vmatprep.subr.mxu0 %v2325_v24 }
 0xefe   :  { %4024 = vmatpush3.msra.mxu0 %v2325_v24  ;;  %v4192_v24 = vld [vmem:[%s5480_s11 + $0x28] sm:$0xff] }
 0xeff   :  { %4025 = vmatprep.subr.mxu0 %v2324_v26 }
 0xf00   :  { %4026 = vmatpush3.msra.mxu0 %v2324_v26  ;;  %v4194_v26 = vld [vmem:[%s5480_s11 + $0x18] sm:$0xff] }
 0xf01   :  { %4027 = vmatprep.subr.mxu0 %v2323_v28 }
 0xf02   :  { %4028 = vmatpush3.msra.mxu0 %v2323_v28  ;;  %v4196_v28 = vld [vmem:[%s5480_s11 + $0x8] sm:$0xff] }
 0xf03   :  { %4029 = vmatprep.subr.mxu0 %v2322_v30 }
 0xf04   :  { %4030 = vmatpush3.msra.mxu0 %v2322_v30 }
 0xf05   :  { %4031 = vmatprep.subr.mxu0 %v2321_v32 }
 0xf06   :  { %4032 = vmatpush3.msra.mxu0 %v2321_v32 }
 0xf07   :  { %4033 = vmatprep.subr.mxu0 %v2320_v12 }
 0xf08   :  { %4034 = vmatpush3.msra.mxu0 %v2320_v12 }
 0xf09   :  { %4035 = vmatprep.subr.mxu0 %v2319_v35 }
 0xf0a   :  { %4036 = vmatpush3.msra.mxu0 %v2319_v35  ;;  %v3047_v35 = vld [vmem:[%s5473_s4 + $0x2] ss:$0 sm:$0xff] }
 0xf0b   :  { %4037 = vmatprep.subr.mxu0 %v2318_v40 }
 0xf0c   :  { %4038 = vmatpush3.msra.mxu0 %v2318_v40 }
 0xf0d   :  { %4039 = vmatprep.subr.mxu0 %v2317_v46 }
 0xf0e   :  { %4040 = vmatpush3.msra.mxu0 %v2317_v46 }
 0xf0f   :  { %4041 = vmatprep.subr.mxu0 %v2316_v55 }
 0xf10   :  { %4042 = vmatpush3.msra.mxu0 %v2316_v55 }
 0xf11   :  { %4043 = vmatprep.subr.mxu0 %v2315_v16 }
 0xf12   :  { %4044 = vmatpush3.msra.mxu0 %v2315_v16 }
 0xf13   :  { %4083 = vmatprep.subr.mxu0 %v5535_v54 }
 0xf58   :  { %v3972_v48 = vpop.f32.mrf.mxu1 }
 0xf5a   :  { %v2479_v63 = vpop.f32.mrf.mxu1 }
 0xfb3   :  { %v2399_v14 = vpop.f32.mrf.mxu0 }
 0xfb4   :  { %v2406_v61 = vrot.slane %v2399_v14, %v5538_v39 }
 0xfb5   :  { %v3967_v1 = vpop.f32.mrf.mxu0 }
 0xfb6   :  { %v2480_v3 = vadd.f32 %v2479_v63, %v2406_v61  ;;  %v2485_v5 = vadd.f32 %v3972_v48, %v2406_v61  ;;  %v4198_v63 = vld [vmem:[%s5475_s6] sm:$0x3] }
 0xfb8   :  { %vm2489_vm12 = vcmp.gt.f32.partialorder %v2485_v5, 0.0  ;;  %v2491_v7 = vmul.f32 0.2, %v2485_v5  ;;  %vm2488_vm13 = vcmp.gt.f32.partialorder %v2480_v3, 0.0  ;;  %v2490_v9 = vmul.f32 0.2, %v2480_v3 }
 0xfba   :  { %v2493_v11 = vsel %vm2489_vm12, %v2485_v5, %v2491_v7  ;;  %v2492_v13 = vsel %vm2488_vm13, %v2480_v3, %v2490_v9 }
 0xfbb   :  { %v2495_v17 = vadd.f32 %v4180_v15, %v2493_v11  ;;  %v2494_v39 = vadd.f32 %v4181_v20, %v2492_v13 }
 0xfbd   :  { %2498 = vmax.xlane.f32.xlu1 %v2495_v17  ;;  %2496 = vmax.xlane.f32.xlu0 %v2494_v39 }
0x1046   :  { %v2499_v43 = vpop.xlane.xlu1 %2498  ;;  %v2497_v18 = vpop.xlane.xlu0 %2496 }
0x1047   :  { %v2501_v21 = vsub.f32 %v2495_v17, %v2499_v43  ;;  %v2500_v41 = vsub.f32 %v2494_v39, %v2497_v18 }
0x1049   :  { %v2504_v44 = vmul.f32 1.442695, %v2501_v21  ;;  %v2502_v45 = vmul.f32 1.442695, %v2500_v41 }
0x104b   :  { %4119 = vpow2.f32 %v2504_v44 }
0x104c   :  { %4121 = vpow2.f32 %v2502_v45 }
0x1058   :  { %v5391_v49 = vpop.eup %4119 }
0x1059   :  { %v5393_v50 = vpop.eup %4121 }
0x105a   :  { %4005 = vmatprep.mubr.f32.mxu1 %v5393_v50 }
0x105b   :  { %4006 = vmatmul.mubr.f32.vlgmr.msra.gmra.mxu1 %v5391_v49 }
0x105c   :  { %4009 = vmatpush3.msra.mxu1 %v5058_v19  ;;  %v4183_v19 = vld [vmem:[%s5480_s11 + $0x70] sm:$0xff] }
0x105d   :  { %4048 = vmatprep.subr.mxu1 %v4182_v52 }
0x111b   :  { %v4007_v53 = vpop.f32.mrf.mxu1 }
0x111c   :  { %v2582_v0 = vmax.f32 %v4007_v53, 1e-30 }
0x111d   :  { %v2572_v10 = vpop.f32.mrf.mxu1 }
0x111e   :  { %v2581_v56 = vmax.f32 %v2572_v10, 1e-30  ;;  %4123 = vrcp.f32 %v2582_v0 }
0x1120   :  { %4125 = vrcp.f32 %v2581_v56 }
0x112b   :  { %v4124_v4 = vpop.eup %4123 }
0x112c   :  { %v2586_v60 = vmul.f32 0.125, %v4124_v4 }
0x112d   :  { %v4126_v2 = vpop.eup %4125 }
0x112e   :  { %v2585_v59 = vmul.f32 0.125, %v4126_v2 }
0x1130   :  { %4010 = vmatprep.mubr.msk.f32.mxu1 %vm115_vm0, %v2585_v59 }
0x1131   :  { %4011 = vmatmul.mubr.msk.f32.vlgmr.msra.gmra.mxu1 %vm115_vm0, %v2586_v60 }
0x1132   :  { %4049 = vmatpush3.msra.mxu1 %v4182_v52 }
0x1133   :  { %4050 = vmatprep.subr.mxu1 %v4183_v19 }
0x1134   :  { %4051 = vmatpush3.msra.mxu1 %v4183_v19 }
0x1135   :  { %4052 = vmatprep.subr.mxu1 %v4184_v6 }
0x1136   :  { %4053 = vmatpush3.msra.mxu1 %v4184_v6 }
0x1137   :  { %4054 = vmatprep.subr.mxu1 %v4185_v51 }
0x1138   :  { %4055 = vmatpush3.msra.mxu1 %v4185_v51 }
0x1139   :  { %4056 = vmatprep.subr.mxu1 %v4186_v57 }
0x113a   :  { %4057 = vmatpush3.msra.mxu1 %v4186_v57 }
0x113b   :  { %4058 = vmatprep.subr.mxu1 %v4187_v38 }
0x113c   :  { %4059 = vmatpush3.msra.mxu1 %v4187_v38 }
0x113d   :  { %4060 = vmatprep.subr.mxu1 %v4188_v62 }
0x113e   :  { %4061 = vmatpush3.msra.mxu1 %v4188_v62 }
0x113f   :  { %4062 = vmatprep.subr.mxu1 %v4189_v8 }
0x1140   :  { %4063 = vmatpush3.msra.mxu1 %v4189_v8 }
0x1141   :  { %4064 = vmatprep.subr.mxu1 %v4190_v22 }
0x1142   :  { %4065 = vmatpush3.msra.mxu1 %v4190_v22 }
0x1143   :  { %4066 = vmatprep.subr.mxu1 %v4191_v23 }
0x1144   :  { %4067 = vmatpush3.msra.mxu1 %v4191_v23 }
0x1145   :  { %4068 = vmatprep.subr.mxu1 %v4192_v24 }
0x1146   :  { %4069 = vmatpush3.msra.mxu1 %v4192_v24 }
0x1147   :  { %4070 = vmatprep.subr.mxu1 %v4193_v25 }
0x1148   :  { %4071 = vmatpush3.msra.mxu1 %v4193_v25 }
0x1149   :  { %4072 = vmatprep.subr.mxu1 %v4194_v26 }
0x114a   :  { %4073 = vmatpush3.msra.mxu1 %v4194_v26 }
0x114b   :  { %4074 = vmatprep.subr.mxu1 %v4195_v27 }
0x114c   :  { %4075 = vmatpush3.msra.mxu1 %v4195_v27 }
0x114d   :  { %4076 = vmatprep.subr.mxu1 %v4196_v28 }
0x114e   :  { %4077 = vmatpush3.msra.mxu1 %v4196_v28 }
0x114f   :  { %4078 = vmatprep.subr.mxu1 %v4197_v29 }
0x1150   :  { %4079 = vmatpush3.msra.mxu1 %v4197_v29 }
0x11f1   :  { %v4012_v30 = vpop.f32.mrf.mxu1 }
0x11f2   :  { %v2669_v33 = vmul.f32 %v5391_v49, %v4012_v30 }
0x11f3   :  { %v2659_v31 = vpop.f32.mrf.mxu1 }
0x11f4   :  { %v2668_v32 = vmul.f32 %v5393_v50, %v2659_v31 }
0x11f6   :  { %4045 = vmatprep.mubr.f32.mxu0 %v2668_v32 }
0x11f7   :  { %4046 = vmatmul.mubr.f32.vlgmr.msra.gmra.mxu0 %v2669_v33 }
0x11f8   :  { %4087 = vmatprep.mubr.msk.f32.mxu0 %vm4222_vm2, %v5535_v54 }
0x12b7   :  { %v4047_v12 = vpop.f32.mrf.mxu0 }
0x12b9   :  { %v2736_v34 = vpop.f32.mrf.mxu0 }
0x12ba   :  { %4080 = vmatprep.mubr.f32.mxu1 %v2736_v34 }
0x12bb   :  { %4081 = vmatmul.mubr.f32.vlgmr.msra.gmra.mxu1 %v4047_v12 }
0x137b   :  { %v4082_v36 = vpop.f32.mrf.mxu1 }
0x137c   :  { %v2825_v40 = vadd.f32 %v4082_v36, %v3047_v35 }
0x137d   :  { %v2819_v42 = vpop.f32.mrf.mxu1 }
0x137e   :  { %v2832_v46 = vmul.f32 1.442695, %v2825_v40  ;;  %v2820_v47 = vadd.f32 %v3047_v35, %v2819_v42  ;;  %vm2829_vm14 = vcmp.gt.f32.partialorder %v2825_v40, 0.0 }
0x1380   :  { %4127 = vpow2.f32 %v2832_v46  ;;  %v2830_v55 = vmul.f32 1.442695, %v2820_v47  ;;  %vm2828_vm15 = vcmp.gt.f32.partialorder %v2820_v47, 0.0 }
0x1382   :  { %4129 = vpow2.f32 %v2830_v55 }
0x138d   :  { %v4128_v58 = vpop.eup %4127 }
0x138e   :  { %v3049_v16 = vadd.f32 -1.0, %v4128_v58 }
0x138f   :  { %v4130_v37 = vpop.eup %4129 }
0x1390   :  { %v2837_v48 = vsel %vm2829_vm14, %v2825_v40, %v3049_v16  ;;  %v3048_v14 = vadd.f32 -1.0, %v4130_v37 }
0x1391   :  { %4084 = vmatpush3.msra.mxu0 %v2837_v48  ;;  %2911 = vst.msk [vmem:[#allocation2 + $0x8] sm:$0xff] %vm288_vm1, %v2837_v48 }
0x1392   :  { %4085 = vmatprep.subr.mxu0 %v5535_v54  ;;  %v2836_v61 = vsel %vm2828_vm15, %v2820_v47, %v3048_v14 }
0x1393   :  { %4086 = vmatpush3.msra.mxu0 %v2836_v61  ;;  %2910 = vst.msk [vmem:[#allocation2] sm:$0xff] %vm288_vm1, %v2836_v61 }
0x1394   :  { %4088 = vmatmul.mubr.msk.f32.vlgmr.msra.gmra.mxu0 %vm288_vm1, %v4198_v63 }
0x1395   :  { %4210 = shalt.err (!%p4207_p4)
}
0x1396   :  { %s4224_s28 = smov 128   ;;  %s4225_s9 = smov 8  }
0x1397   :  { %2925 = dma.vmem_to_hbm [thread:$0]  %s2920_s26, 256, %s5482_s13, [#allocation3], %s4224_s28, %s4224_s28, %s4225_s9  }
0x1454   :  { %v2904_v54 = vpop.f32.mrf.mxu0 }
0x1455   :  { %3051 = vst.msk [vmem:[%s5481_s12 + $0x4] sm:$0x3] %vm1076_vm7, %v2904_v54 }
0x1456   :  { %v4089_v1 = vpop.f32.mrf.mxu0 }
0x1457   :  { %4219 = dma.done.wait [#allocation3], 256  }
0x1458   :  { %4220 = vsyncadd [#allocation3], 4294967040 }
0x1459   :  { %2931 = vsyncpa [#allocation3], 1 }

</bundles_post_ra>
